<compile_context>
chip_gen: v7x
topology: tpu7x:2x2x1
jax: 0.10.0
libtpu: 0.0.40
codegen_flags: <defaults>
</compile_context>

<pallas_src>
import jax
import jax.numpy as jnp
from jax import lax
from jax.experimental import pallas as pl
from jax.experimental.pallas import tpu as pltpu

EPS = 1e-5


def _mul_conv_bn_kernel_n1(x_ref, s_ref, w_ref, g_ref, b_ref, o_ref):
    # x_ref: (Cin, HW)   s_ref: (1, Cin)   w_ref: (Cout, Cin)
    # g_ref, b_ref: (Cout, 1)   o_ref: (Cout, HW)
    hw = x_ref.shape[1]
    inv_m = 1.0 / hw  # true N*H*W (N == 1)

    # Fold the per-channel scale into the weight (valid because N == 1),
    # then feed the MXU bf16 operands with f32 accumulation.
    w_scaled = (w_ref[...] * s_ref[...]).astype(jnp.bfloat16)   # (Cout, Cin)
    x_bf16 = x_ref[...].astype(jnp.bfloat16)                    # (Cin, HW)
    y = jnp.dot(w_scaled, x_bf16,
                preferred_element_type=jnp.float32)             # (Cout, HW) f32

    # Two-pass BatchNorm statistics (f32 epilogue), lane (axis=-1) reductions.
    mean = jnp.sum(y, axis=1, keepdims=True) * inv_m            # (Cout, 1)
    centered = y - mean
    var = jnp.sum(centered * centered, axis=1, keepdims=True) * inv_m
    inv = lax.rsqrt(var + EPS)
    o_ref[...] = (centered * inv * g_ref[...] + b_ref[...]).astype(o_ref.dtype)


def _mul_conv_bn_kernel_batched(x_ref, s_ref, w_ref, g_ref, b_ref, o_ref):
    # General N > 1 path (scale is per-sample, so it is folded per sample).
    # x_ref: (N, Cin, HW)  s_ref: (N, 1, Cin)  w_ref: (Cout, Cin)
    # g_ref, b_ref: (1, Cout, 1)  o_ref: (N, Cout, HW) -- always f32 so BN
    # stats are computed from unrounded matmul results (no extra scratch).
    n, _, hw = x_ref.shape
    inv_m = 1.0 / (n * hw)

    def body(i, carry):
        ws = (w_ref[...] * s_ref[i]).astype(jnp.bfloat16)       # (Cout, Cin)
        o_ref[i] = jnp.dot(ws, x_ref[i].astype(jnp.bfloat16),
                           preferred_element_type=jnp.float32)  # (Cout, HW)
        return carry

    lax.fori_loop(0, n, body, 0, unroll=True)

    y = o_ref[...]                                              # f32
    mean = jnp.sum(y, axis=(0, 2), keepdims=True) * inv_m       # (1, Cout, 1)
    centered = y - mean
    var = jnp.sum(centered * centered, axis=(0, 2), keepdims=True) * inv_m
    inv = lax.rsqrt(var + EPS)
    o_ref[...] = centered * inv * g_ref[...] + b_ref[...]


def mul_conv2d_batchnorm(x_nchw, s_nc11, conv_w, gamma, beta):
    """x_nchw: (N, Cin, H, W); s_nc11: (N, Cin, 1, 1);
    conv_w: (Cout, Cin, 1, 1); gamma/beta: (Cout,). Returns (N, Cout, H, W)."""
    n, cin, h, w = x_nchw.shape
    cout = conv_w.shape[0]
    hw = h * w

    # glue: pure reshapes only (no transposes anywhere)
    wm = conv_w.reshape(cout, cin)                        # (Cout, Cin)
    g = gamma.reshape(cout, 1)
    b = beta.reshape(cout, 1)

    def vmem_specs(k):
        return [pl.BlockSpec(memory_space=pltpu.VMEM) for _ in range(k)]

    cost = pl.CostEstimate(
        flops=2 * n * cout * cin * hw,
        transcendentals=cout,
        bytes_accessed=4 * (n * cin * hw + cout * cin + n * cout * hw
                            + n * cin + 2 * cout),
    )

    if n == 1:
        x2d = x_nchw.reshape(cin, hw)                     # view of NCHW
        s = s_nc11.reshape(1, cin)
        out2d = pl.pallas_call(
            _mul_conv_bn_kernel_n1,
            out_shape=jax.ShapeDtypeStruct((cout, hw), x_nchw.dtype),
            in_specs=vmem_specs(5),
            out_specs=pl.BlockSpec(memory_space=pltpu.VMEM),
            cost_estimate=cost,
        )(x2d, s, wm, g, b)
        return out2d.reshape(1, cout, h, w)               # view, no transpose

    # N > 1: per-sample scale; output laid out (N, Cout, HW), computed in f32
    # (BN stats must come from unrounded y) and cast afterwards if needed.
    # TODO(synk): if this layer runs over many feature maps, batch them into
    # the result-lane dimension of a single contraction instead of one
    # 196-lane matmul per sample (raises MXU occupancy on v6e/v7x).
    x3d = x_nchw.reshape(n, cin, hw)
    s = s_nc11.reshape(n, 1, cin)
    out3d = pl.pallas_call(
        _mul_conv_bn_kernel_batched,
        out_shape=jax.ShapeDtypeStruct((n, cout, hw), jnp.float32),
        in_specs=vmem_specs(5),
        out_specs=pl.BlockSpec(memory_space=pltpu.VMEM),
        cost_estimate=cost,
    )(x3d, s, wm, g.reshape(1, cout, 1), b.reshape(1, cout, 1))
    if out3d.dtype != x_nchw.dtype:
        out3d = out3d.astype(x_nchw.dtype)
    return out3d.reshape(n, cout, h, w)


def _reference(x_nchw, s_nc11, conv_w, gamma, beta):
    xs = x_nchw * s_nc11
    y = lax.conv_general_dilated(
        xs, conv_w, window_strides=(1, 1), padding="VALID",
        dimension_numbers=("NCHW", "OIHW", "NCHW"))
    mean = jnp.mean(y, axis=(0, 2, 3), keepdims=True)
    var = jnp.mean((y - mean) ** 2, axis=(0, 2, 3), keepdims=True)
    return (y - mean) / jnp.sqrt(var + EPS) * gamma.reshape(1, -1, 1, 1) \
        + beta.reshape(1, -1, 1, 1)


if __name__ == "__main__":
    key = jax.random.PRNGKey(0)
    k1, k2, k3 = jax.random.split(key, 3)

    N, CIN, H, W = 1, 672, 14, 14
    COUT = 160

    x241 = jax.random.normal(k1, (N, CIN, H, W), dtype=jnp.float32)
    x246 = jax.random.normal(k2, (N, CIN, 1, 1), dtype=jnp.float32)

    # deterministic parameter init (synthetic; no checkpoint load)
    conv_w = jax.random.normal(k3, (COUT, CIN, 1, 1), dtype=jnp.float32) * 0.02
    gamma = jnp.ones((COUT,), dtype=jnp.float32)   # BatchNorm2d default
    beta = jnp.zeros((COUT,), dtype=jnp.float32)   # BatchNorm2d default

    out = mul_conv2d_batchnorm(x241, x246, conv_w, gamma, beta)
    out = jax.block_until_ready(out)

    ref = _reference(x241, x246, conv_w, gamma, beta)
    assert out.shape == (N, COUT, H, W)
    # bf16 MXU operands (f32 accumulation) => relax tolerance vs f32 reference.
    assert jnp.allclose(out, ref, atol=2e-2, rtol=2e-2)

    # TODO(synk): BatchNorm2d running_mean/running_var buffer updates (training
    # side effect) are not materialized since the module only returns x249.
    print("KERNEL_OK")
</pallas_src>

<mosaic_0001>
module attributes {stable_mosaic.version = 11 : i64} {
  func.func @_mul_conv_bn_kernel_n1(%arg0: memref<672x196xf32, #tpu.memory_space<vmem>>, %arg1: memref<1x672xf32, #tpu.memory_space<vmem>>, %arg2: memref<160x672xf32, #tpu.memory_space<vmem>>, %arg3: memref<160x1xf32, #tpu.memory_space<vmem>>, %arg4: memref<160x1xf32, #tpu.memory_space<vmem>>, %arg5: memref<160x196xf32, #tpu.memory_space<vmem>>) attributes {dimension_semantics = [], scalar_prefetch = 0 : i64, scratch_operands = 0 : i64, tpu.core_type = #tpu.core_type<tc>} {
    %c0 = arith.constant 0 : index
    %c0_0 = arith.constant 0 : index
    %0 = vector.load %arg2[%c0, %c0_0] : memref<160x672xf32, #tpu.memory_space<vmem>>, vector<160x672xf32>
    %c0_1 = arith.constant 0 : index
    %c0_2 = arith.constant 0 : index
    %1 = vector.load %arg1[%c0_1, %c0_2] : memref<1x672xf32, #tpu.memory_space<vmem>>, vector<1x672xf32>
    %2 = vector.broadcast %1 : vector<1x672xf32> to vector<160x672xf32>
    %3 = arith.mulf %0, %2 : vector<160x672xf32>
    %4 = arith.truncf %3 : vector<160x672xf32> to vector<160x672xbf16>
    %c0_3 = arith.constant 0 : index
    %c0_4 = arith.constant 0 : index
    %5 = vector.load %arg0[%c0_3, %c0_4] : memref<672x196xf32, #tpu.memory_space<vmem>>, vector<672x196xf32>
    %6 = arith.truncf %5 : vector<672x196xf32> to vector<672x196xbf16>
    %cst = arith.constant dense<0.000000e+00> : vector<160x196xf32>
    %7 = tpu.matmul %4, %6, %cst {dimension_numbers = #tpu.dot_dimension_numbers<[1], [0], [0], [1], [0, 0, 1, 1], [], []>} : vector<160x672xbf16>, vector<672x196xbf16>, vector<160x196xf32> -> vector<160x196xf32>
    %cst_5 = arith.constant dense<0.000000e+00> : vector<160xf32>
    %8 = vector.multi_reduction <add>, %7, %cst_5 [1] : vector<160x196xf32> to vector<160xf32>
    %9 = vector.shape_cast %8 : vector<160xf32> to vector<160x1xf32>
    %cst_6 = arith.constant 0.00510204071 : f32
    %10 = vector.broadcast %cst_6 : f32 to vector<160x1xf32>
    %11 = arith.mulf %9, %10 : vector<160x1xf32>
    %12 = vector.broadcast %11 : vector<160x1xf32> to vector<160x196xf32>
    %13 = arith.subf %7, %12 : vector<160x196xf32>
    %14 = arith.mulf %13, %13 : vector<160x196xf32>
    %cst_7 = arith.constant dense<0.000000e+00> : vector<160xf32>
    %15 = vector.multi_reduction <add>, %14, %cst_7 [1] : vector<160x196xf32> to vector<160xf32>
    %16 = vector.shape_cast %15 : vector<160xf32> to vector<160x1xf32>
    %cst_8 = arith.constant 0.00510204071 : f32
    %17 = vector.broadcast %cst_8 : f32 to vector<160x1xf32>
    %18 = arith.mulf %16, %17 : vector<160x1xf32>
    %cst_9 = arith.constant 9.99999974E-6 : f32
    %19 = vector.broadcast %cst_9 : f32 to vector<160x1xf32>
    %20 = arith.addf %18, %19 : vector<160x1xf32>
    %21 = math.rsqrt %20 : vector<160x1xf32>
    %22 = vector.broadcast %21 : vector<160x1xf32> to vector<160x196xf32>
    %23 = arith.mulf %13, %22 : vector<160x196xf32>
    %c0_10 = arith.constant 0 : index
    %c0_11 = arith.constant 0 : index
    %24 = vector.load %arg3[%c0_10, %c0_11] : memref<160x1xf32, #tpu.memory_space<vmem>>, vector<160x1xf32>
    %25 = vector.broadcast %24 : vector<160x1xf32> to vector<160x196xf32>
    %26 = arith.mulf %23, %25 : vector<160x196xf32>
    %c0_12 = arith.constant 0 : index
    %c0_13 = arith.constant 0 : index
    %27 = vector.load %arg4[%c0_12, %c0_13] : memref<160x1xf32, #tpu.memory_space<vmem>>, vector<160x1xf32>
    %28 = vector.broadcast %27 : vector<160x1xf32> to vector<160x196xf32>
    %29 = arith.addf %26, %28 : vector<160x196xf32>
    %c0_14 = arith.constant 0 : index
    %c0_15 = arith.constant 0 : index
    %30 = vector.load %arg5[%c0_14, %c0_15] : memref<160x196xf32, #tpu.memory_space<vmem>>, vector<160x196xf32>
    tpu.vector_store %arg5[%c0_14, %c0_15], %29 {strides = array<i32>} : memref<160x196xf32, #tpu.memory_space<vmem>>, vector<160x196xf32>,
    return
  }
}

</mosaic_0001>

<bundles_post_ra>
// kernel: tpu_custom_call.1
= control target key start
LH: loop header
LB: loop body
LE: loop exit
PB: predicated region body
PF: predicated region fallthrough
CT: control target
= control target key end

     0   :  { %vm606_vm0 = vcmask 261120   ;;  %s3868_s0 = inlined_call_operand.vmem [shape: f32[672,196], index: 0, kind: input, shape index: {}]   ;;  %s3869_s1 = inlined_call_operand.vmem [shape: f32[1,672], index: 1, kind: input, shape index: {}]   ;;  %s3870_s2 = inlined_call_operand.vmem [shape: f32[160,672], index: 2, kind: input, shape index: {}]   ;;  %s3871_s3 = inlined_call_operand.vmem [shape: f32[160,1], index: 3, kind: input, shape index: {}]   ;;  %s3872_s4 = inlined_call_operand.vmem [shape: f32[160,1], index: 4, kind: input, shape index: {}]   ;;  %s3873_s5 = inlined_call_operand.hbm [shape: f32[160,196], index: 5, kind: output, shape index: {}]  }
   0x1   :  { %v355_v0 = vld [vmem:[%s3868_s0 + $0x8] sm:$0xff]  ;;  %v357_v1 = vld [vmem:[%s3868_s0 + $0x18] sm:$0xff]  ;;  %v354_v5 = vld [vmem:[%s3868_s0] sm:$0xff] }
   0x2   :  { %v419_v2 = vld [vmem:[%s3868_s0 + $0x208] sm:$0xff]  ;;  %v523_v3 = vpack.c.bf16 %v357_v1, %v355_v0  ;;  %v421_v4 = vld [vmem:[%s3868_s0 + $0x218] sm:$0xff]  ;;  %v356_v6 = vld [vmem:[%s3868_s0 + $0x10] sm:$0xff] }
   0x3   :  { %v2017_v7 = vpack.c.bf16 %v421_v4, %v419_v2  ;;  %v522_v8 = vpack.c.bf16 %v356_v6, %v354_v5  ;;  %v418_v9 = vld [vmem:[%s3868_s0 + $0x200] sm:$0xff]  ;;  %v420_v10 = vld [vmem:[%s3868_s0 + $0x210] sm:$0xff]  ;;  %v359_v11 = vld [vmem:[%s3868_s0 + $0x28] sm:$0xff] }
   0x4   :  { %637 = vmatprep.subr.bf16.mxu1 %v523_v3  ;;  %v2028_v12 = vpack.c.bf16 %v420_v10, %v418_v9  ;;  %v361_v13 = vld [vmem:[%s3868_s0 + $0x38] sm:$0xff]  ;;  %v423_v14 = vld [vmem:[%s3868_s0 + $0x228] sm:$0xff]  ;;  %v358_v18 = vld [vmem:[%s3868_s0 + $0x20] sm:$0xff] }
   0x5   :  { %v425_v15 = vld [vmem:[%s3868_s0 + $0x238] sm:$0xff]  ;;  %770 = vmatprep.subr.bf16.mxu0 %v2017_v7  ;;  %638 = vmatpush1.bf16.msra.mxu1 %v522_v8  ;;  %v525_v16 = vpack.c.bf16 %v361_v13, %v359_v11  ;;  %v360_v19 = vld [vmem:[%s3868_s0 + $0x30] sm:$0xff]  ;;  %v422_v20 = vld [vmem:[%s3868_s0 + $0x220] sm:$0xff] }
   0x6   :  { %v2040_v17 = vpack.c.bf16 %v425_v15, %v423_v14  ;;  %771 = vmatpush1.bf16.msra.mxu0 %v2028_v12  ;;  %v524_v21 = vpack.c.bf16 %v360_v19, %v358_v18  ;;  %v424_v22 = vld [vmem:[%s3868_s0 + $0x230] sm:$0xff]  ;;  %v363_v23 = vld [vmem:[%s3868_s0 + $0x48] sm:$0xff]  ;;  %v365_v24 = vld [vmem:[%s3868_s0 + $0x58] sm:$0xff] }
   0x7   :  { %639 = vmatprep.subr.bf16.mxu1 %v525_v16  ;;  %v2062_v25 = vpack.c.bf16 %v424_v22, %v422_v20  ;;  %v527_v26 = vpack.c.bf16 %v365_v24, %v363_v23  ;;  %v427_v27 = vld [vmem:[%s3868_s0 + $0x248] sm:$0xff]  ;;  %v429_v28 = vld [vmem:[%s3868_s0 + $0x258] sm:$0xff]  ;;  %v362_v29 = vld [vmem:[%s3868_s0 + $0x40] sm:$0xff] }
   0x8   :  { %772 = vmatprep.subr.bf16.mxu0 %v2040_v17  ;;  %v2073_v30 = vpack.c.bf16 %v429_v28, %v427_v27  ;;  %v364_v31 = vld [vmem:[%s3868_s0 + $0x50] sm:$0xff]  ;;  %v426_v32 = vld [vmem:[%s3868_s0 + $0x240] sm:$0xff]  ;;  %v367_v35 = vld [vmem:[%s3868_s0 + $0x68] sm:$0xff] }
   0x9   :  { %v428_v33 = vld [vmem:[%s3868_s0 + $0x250] sm:$0xff]  ;;  %640 = vmatpush1.bf16.msra.mxu1 %v524_v21  ;;  %v526_v34 = vpack.c.bf16 %v364_v31, %v362_v29  ;;  %v369_v36 = vld [vmem:[%s3868_s0 + $0x78] sm:$0xff]  ;;  %v431_v37 = vld [vmem:[%s3868_s0 + $0x268] sm:$0xff] }
   0xa   :  { %773 = vmatpush1.bf16.msra.mxu0 %v2062_v25  ;;  %641 = vmatprep.subr.bf16.mxu1 %v527_v26  ;;  %v2094_v38 = vpack.c.bf16 %v428_v33, %v426_v32  ;;  %v529_v39 = vpack.c.bf16 %v369_v36, %v367_v35  ;;  %v433_v40 = vld [vmem:[%s3868_s0 + $0x278] sm:$0xff]  ;;  %v366_v41 = vld [vmem:[%s3868_s0 + $0x60] sm:$0xff]  ;;  %v368_v42 = vld [vmem:[%s3868_s0 + $0x70] sm:$0xff] }
   0xb   :  { %774 = vmatprep.subr.bf16.mxu0 %v2073_v30  ;;  %v2106_v43 = vpack.c.bf16 %v433_v40, %v431_v37  ;;  %v430_v44 = vld [vmem:[%s3868_s0 + $0x260] sm:$0xff]  ;;  %v432_v45 = vld [vmem:[%s3868_s0 + $0x270] sm:$0xff]  ;;  %v371_v46 = vld [vmem:[%s3868_s0 + $0x88] sm:$0xff]  ;;  %v528_v50 = vpack.c.bf16 %v368_v42, %v366_v41 }
   0xc   :  { %v373_v47 = vld [vmem:[%s3868_s0 + $0x98] sm:$0xff]  ;;  %v435_v48 = vld [vmem:[%s3868_s0 + $0x288] sm:$0xff]  ;;  %v2127_v51 = vpack.c.bf16 %v432_v45, %v430_v44  ;;  %v370_v53 = vld [vmem:[%s3868_s0 + $0x80] sm:$0xff] }
   0xd   :  { %v437_v49 = vld [vmem:[%s3868_s0 + $0x298] sm:$0xff]  ;;  %642 = vmatpush1.bf16.msra.mxu1 %v526_v34  ;;  %v531_v52 = vpack.c.bf16 %v373_v47, %v371_v46  ;;  %v372_v54 = vld [vmem:[%s3868_s0 + $0x90] sm:$0xff]  ;;  %v434_v55 = vld [vmem:[%s3868_s0 + $0x280] sm:$0xff] }
   0xe   :  { %775 = vmatpush1.bf16.msra.mxu0 %v2094_v38  ;;  %643 = vmatprep.subr.bf16.mxu1 %v529_v39  ;;  %v2139_v56 = vpack.c.bf16 %v437_v49, %v435_v48  ;;  %v436_v57 = vld [vmem:[%s3868_s0 + $0x290] sm:$0xff]  ;;  %v375_v58 = vld [vmem:[%s3868_s0 + $0xa8] sm:$0xff]  ;;  %v377_v59 = vld [vmem:[%s3868_s0 + $0xb8] sm:$0xff]  ;;  %v530_v62 = vpack.c.bf16 %v372_v54, %v370_v53 }
   0xf   :  { %776 = vmatprep.subr.bf16.mxu0 %v2106_v43  ;;  %v439_v60 = vld [vmem:[%s3868_s0 + $0x2a8] sm:$0xff]  ;;  %v441_v61 = vld [vmem:[%s3868_s0 + $0x2b8] sm:$0xff]  ;;  %v2157_v63 = vpack.c.bf16 %v436_v57, %v434_v55  ;;  %v533_v0 = vpack.c.bf16 %v377_v59, %v375_v58  ;;  %v374_v1 = vld [vmem:[%s3868_s0 + $0xa0] sm:$0xff]  ;;  %v144_v55 = vlaneseq }
  0x10   :  { %v376_v2 = vld [vmem:[%s3868_s0 + $0xb0] sm:$0xff]  ;;  %v438_v3 = vld [vmem:[%s3868_s0 + $0x2a0] sm:$0xff]  ;;  %v2169_v4 = vpack.c.bf16 %v441_v61, %v439_v60  ;;  %v379_v6 = vld [vmem:[%s3868_s0 + $0xc8] sm:$0xff] }
  0x11   :  { %644 = vmatpush1.bf16.msra.mxu1 %v528_v50  ;;  %v440_v5 = vld [vmem:[%s3868_s0 + $0x2b0] sm:$0xff]  ;;  %v381_v8 = vld [vmem:[%s3868_s0 + $0xd8] sm:$0xff]  ;;  %v443_v9 = vld [vmem:[%s3868_s0 + $0x2c8] sm:$0xff]  ;;  %v532_v11 = vpack.c.bf16 %v376_v2, %v374_v1 }
  0x12   :  { %777 = vmatpush1.bf16.msra.mxu0 %v2127_v51  ;;  %645 = vmatprep.subr.bf16.mxu1 %v531_v52  ;;  %v445_v10 = vld [vmem:[%s3868_s0 + $0x2d8] sm:$0xff]  ;;  %v2187_v13 = vpack.c.bf16 %v440_v5, %v438_v3  ;;  %v535_v14 = vpack.c.bf16 %v381_v8, %v379_v6  ;;  %v378_v15 = vld [vmem:[%s3868_s0 + $0xc0] sm:$0xff]  ;;  %v380_v16 = vld [vmem:[%s3868_s0 + $0xd0] sm:$0xff]  ;;  %v2306_v8 = vshrl.u32 %v144_v55, 7 }
  0x13   :  { %778 = vmatprep.subr.bf16.mxu0 %v2139_v56  ;;  %v442_v18 = vld [vmem:[%s3868_s0 + $0x2c0] sm:$0xff]  ;;  %v2199_v19 = vpack.c.bf16 %v445_v10, %v443_v9  ;;  %v444_v20 = vld [vmem:[%s3868_s0 + $0x2d0] sm:$0xff]  ;;  %v383_v21 = vld [vmem:[%s3868_s0 + $0xe8] sm:$0xff]  ;;  %v534_v26 = vpack.c.bf16 %v380_v16, %v378_v15 }
  0x14   :  { %v385_v22 = vld [vmem:[%s3868_s0 + $0xf8] sm:$0xff]  ;;  %v447_v23 = vld [vmem:[%s3868_s0 + $0x2e8] sm:$0xff]  ;;  %v2217_v27 = vpack.c.bf16 %v444_v20, %v442_v18  ;;  %v382_v29 = vld [vmem:[%s3868_s0 + $0xe0] sm:$0xff] }
  0x15   :  { %646 = vmatpush1.bf16.msra.mxu1 %v530_v62  ;;  %v449_v24 = vld [vmem:[%s3868_s0 + $0x2f8] sm:$0xff]  ;;  %v537_v28 = vpack.c.bf16 %v385_v22, %v383_v21  ;;  %v384_v31 = vld [vmem:[%s3868_s0 + $0xf0] sm:$0xff]  ;;  %v446_v32 = vld [vmem:[%s3868_s0 + $0x2e0] sm:$0xff]  ;;  %v1965_v22 = vmov 0  }
  0x16   :  { %779 = vmatpush1.bf16.msra.mxu0 %v2157_v63  ;;  %647 = vmatprep.subr.bf16.mxu1 %v533_v0  ;;  %v2229_v33 = vpack.c.bf16 %v449_v24, %v447_v23  ;;  %v448_v34 = vld [vmem:[%s3868_s0 + $0x2f0] sm:$0xff]  ;;  %v387_v35 = vld [vmem:[%s3868_s0 + $0x108] sm:$0xff]  ;;  %v389_v36 = vld [vmem:[%s3868_s0 + $0x118] sm:$0xff]  ;;  %v536_v40 = vpack.c.bf16 %v384_v31, %v382_v29 }
  0x17   :  { %780 = vmatprep.subr.bf16.mxu0 %v2169_v4  ;;  %v451_v37 = vld [vmem:[%s3868_s0 + $0x308] sm:$0xff]  ;;  %v453_v39 = vld [vmem:[%s3868_s0 + $0x318] sm:$0xff]  ;;  %v2247_v41 = vpack.c.bf16 %v448_v34, %v446_v32  ;;  %v539_v42 = vpack.c.bf16 %v389_v36, %v387_v35  ;;  %v386_v44 = vld [vmem:[%s3868_s0 + $0x100] sm:$0xff]  ;;  %1900 = vset.pattern.permute.xlu1 %v1965_v22  ;;  %v150_v32 = vsub.s32 1, %v2306_v8  ;;  %v158_v34 = vsub.s32 3, %v2306_v8 }
  0x18   :  { %v388_v45 = vld [vmem:[%s3868_s0 + $0x110] sm:$0xff]  ;;  %v450_v46 = vld [vmem:[%s3868_s0 + $0x300] sm:$0xff]  ;;  %v2259_v47 = vpack.c.bf16 %v453_v39, %v451_v37  ;;  %v391_v49 = vld [vmem:[%s3868_s0 + $0x128] sm:$0xff]  ;;  %1899 = vset.pattern.permute.xlu0 %v1965_v22 }
  0x19   :  { %648 = vmatpush1.bf16.msra.mxu1 %v532_v11  ;;  %v452_v48 = vld [vmem:[%s3868_s0 + $0x310] sm:$0xff]  ;;  %v393_v50 = vld [vmem:[%s3868_s0 + $0x138] sm:$0xff]  ;;  %v455_v52 = vld [vmem:[%s3868_s0 + $0x328] sm:$0xff]  ;;  %v538_v54 = vpack.c.bf16 %v388_v45, %v386_v44 }
  0x1a   :  { %781 = vmatpush1.bf16.msra.mxu0 %v2187_v13  ;;  %649 = vmatprep.subr.bf16.mxu1 %v535_v14  ;;  %v457_v53 = vld [vmem:[%s3868_s0 + $0x338] sm:$0xff]  ;;  %v2277_v57 = vpack.c.bf16 %v452_v48, %v450_v46  ;;  %v541_v58 = vpack.c.bf16 %v393_v50, %v391_v49  ;;  %v390_v59 = vld [vmem:[%s3868_s0 + $0x120] sm:$0xff]  ;;  %v392_v60 = vld [vmem:[%s3868_s0 + $0x130] sm:$0xff] }
  0x1b   :  { %782 = vmatprep.subr.bf16.mxu0 %v2199_v19  ;;  %v454_v61 = vld [vmem:[%s3868_s0 + $0x320] sm:$0xff]  ;;  %v2289_v62 = vpack.c.bf16 %v457_v53, %v455_v52  ;;  %v456_v0 = vld [vmem:[%s3868_s0 + $0x330] sm:$0xff]  ;;  %v395_v1 = vld [vmem:[%s3868_s0 + $0x148] sm:$0xff]  ;;  %v540_v6 = vpack.c.bf16 %v392_v60, %v390_v59 }
  0x1c   :  { %v397_v2 = vld [vmem:[%s3868_s0 + $0x158] sm:$0xff]  ;;  %v459_v3 = vld [vmem:[%s3868_s0 + $0x348] sm:$0xff]  ;;  %v2309_v9 = vpack.c.bf16 %v456_v0, %v454_v61  ;;  %v394_v11 = vld [vmem:[%s3868_s0 + $0x140] sm:$0xff] }
  0x1d   :  { %650 = vmatpush1.bf16.msra.mxu1 %v534_v26  ;;  %v461_v5 = vld [vmem:[%s3868_s0 + $0x358] sm:$0xff]  ;;  %v543_v10 = vpack.c.bf16 %v397_v2, %v395_v1  ;;  %v396_v14 = vld [vmem:[%s3868_s0 + $0x150] sm:$0xff]  ;;  %v458_v15 = vld [vmem:[%s3868_s0 + $0x340] sm:$0xff] }
  0x1e   :  { %783 = vmatpush1.bf16.msra.mxu0 %v2217_v27  ;;  %651 = vmatprep.subr.bf16.mxu1 %v537_v28  ;;  %v2321_v16 = vpack.c.bf16 %v461_v5, %v459_v3  ;;  %v460_v18 = vld [vmem:[%s3868_s0 + $0x350] sm:$0xff]  ;;  %v399_v20 = vld [vmem:[%s3868_s0 + $0x168] sm:$0xff]  ;;  %v401_v21 = vld [vmem:[%s3868_s0 + $0x178] sm:$0xff]  ;;  %v542_v26 = vpack.c.bf16 %v396_v14, %v394_v11 }
  0x1f   :  { %784 = vmatprep.subr.bf16.mxu0 %v2229_v33  ;;  %v463_v23 = vld [vmem:[%s3868_s0 + $0x368] sm:$0xff]  ;;  %v465_v24 = vld [vmem:[%s3868_s0 + $0x378] sm:$0xff]  ;;  %v398_v28 = vld [vmem:[%s3868_s0 + $0x160] sm:$0xff]  ;;  %v2350_v35 = vpack.c.bf16 %v460_v18, %v458_v15  ;;  %v545_v36 = vpack.c.bf16 %v401_v21, %v399_v20 }
  0x20   :  { %v400_v29 = vld [vmem:[%s3868_s0 + $0x170] sm:$0xff]  ;;  %v462_v31 = vld [vmem:[%s3868_s0 + $0x360] sm:$0xff]  ;;  %v403_v39 = vld [vmem:[%s3868_s0 + $0x188] sm:$0xff] }
  0x21   :  { %652 = vmatpush1.bf16.msra.mxu1 %v536_v40  ;;  %v464_v37 = vld [vmem:[%s3868_s0 + $0x370] sm:$0xff]  ;;  %v405_v40 = vld [vmem:[%s3868_s0 + $0x198] sm:$0xff]  ;;  %v467_v44 = vld [vmem:[%s3868_s0 + $0x388] sm:$0xff]  ;;  %v544_v52 = vpack.c.bf16 %v400_v29, %v398_v28 }
  0x22   :  { %785 = vmatpush1.bf16.msra.mxu0 %v2247_v41  ;;  %653 = vmatprep.subr.bf16.mxu1 %v539_v42  ;;  %v2362_v42 = vpack.c.bf16 %v465_v24, %v463_v23  ;;  %v469_v45 = vld [vmem:[%s3868_s0 + $0x398] sm:$0xff]  ;;  %v23_v46 = vld [vmem:[%s3870_s2 + $0x8] sm:$0xff]  ;;  %v2379_v49 = vld [vmem:[%s3869_s1] sm:$0x3f]  ;;  %v547_v59 = vpack.c.bf16 %v405_v40, %v403_v39  ;;  %v146_v40 = vsub.s32 0, %v2306_v8 }
  0x23   :  { %786 = vmatprep.subr.bf16.mxu0 %v2259_v47  ;;  %v29_v48 = vld [vmem:[%s3870_s2 + $0x38] sm:$0xff]  ;;  %v2385_v53 = vrot.slane %v2379_v49, %v150_v32  ;;  %v2391_v55 = vrot.slane %v2379_v49, %v158_v34  ;;  %v2396_v60 = vpack.c.bf16 %v469_v45, %v467_v44  ;;  %v402_v61 = vld [vmem:[%s3868_s0 + $0x180] sm:$0xff]  ;;  %v404_v0 = vld [vmem:[%s3868_s0 + $0x190] sm:$0xff]  ;;  %v154_v45 = vsub.s32 2, %v2306_v8 }
  0x24   :  { %v25_v50 = vld [vmem:[%s3870_s2 + $0x18] sm:$0xff]  ;;  %v466_v1 = vld [vmem:[%s3868_s0 + $0x380] sm:$0xff]  ;;  %v468_v2 = vld [vmem:[%s3868_s0 + $0x390] sm:$0xff]  ;;  %v546_v20 = vpack.c.bf16 %v404_v0, %v402_v61 }
  0x25   :  { %654 = vmatpush1.bf16.msra.mxu1 %v538_v54  ;;  %v31_v54 = vld [vmem:[%s3870_s2 + $0x48] sm:$0xff]  ;;  %v409_v5 = vld [vmem:[%s3868_s0 + $0x1b8] sm:$0xff]  ;;  %v177_v11 = vmul.f32 %v2391_v55, %v25_v50  ;;  %v2428_v23 = vpack.c.bf16 %v468_v2, %v466_v1  ;;  %v408_v28 = vld [vmem:[%s3868_s0 + $0x1b0] sm:$0xff] }
  0x26   :  { %787 = vmatpush1.bf16.msra.mxu0 %v2277_v57  ;;  %655 = vmatprep.subr.bf16.mxu1 %v541_v58  ;;  %v2394_v58 = vpack.c.bf16 %v464_v37, %v462_v31  ;;  %v407_v3 = vld [vmem:[%s3868_s0 + $0x1a8] sm:$0xff]  ;;  %v183_v14 = vmul.f32 %v2391_v55, %v31_v54  ;;  %v473_v18 = vld [vmem:[%s3868_s0 + $0x3b8] sm:$0xff]  ;;  %v470_v29 = vld [vmem:[%s3868_s0 + $0x3a0] sm:$0xff] }
  0x27   :  { %788 = vmatprep.subr.bf16.mxu0 %v2289_v62  ;;  %v471_v15 = vld [vmem:[%s3868_s0 + $0x3a8] sm:$0xff]  ;;  %v549_v24 = vpack.c.bf16 %v409_v5, %v407_v3  ;;  %v472_v32 = vld [vmem:[%s3868_s0 + $0x3b0] sm:$0xff]  ;;  %v477_v39 = vld [vmem:[%s3868_s0 + $0x3d8] sm:$0xff]  ;;  %v2490_v5 = vrot.slane %v2379_v49, %v146_v40 }
  0x28   :  { %v297_v22 = vpack.c.bf16 %v183_v14, %v177_v11  ;;  %v2440_v31 = vpack.c.bf16 %v473_v18, %v471_v15  ;;  %v411_v34 = vld [vmem:[%s3868_s0 + $0x1c8] sm:$0xff]  ;;  %v410_v50 = vld [vmem:[%s3868_s0 + $0x1c0] sm:$0xff]  ;;  %v476_v61 = vld [vmem:[%s3868_s0 + $0x3d0] sm:$0xff]  ;;  %v2502_v15 = vrot.slane %v2379_v49, %v154_v45 }
  0x29   :  { %656 = vmatpush1.bf16.msra.mxu1 %v540_v6  ;;  %v175_v6 = vmul.f32 %v2385_v53, %v23_v46  ;;  %v475_v37 = vld [vmem:[%s3868_s0 + $0x3c8] sm:$0xff]  ;;  %v2460_v46 = vpack.c.bf16 %v472_v32, %v470_v29  ;;  %v474_v54 = vld [vmem:[%s3868_s0 + $0x3c0] sm:$0xff]  ;;  %v417_v1 = vld [vmem:[%s3868_s0 + $0x1f8] sm:$0xff] }
  0x2a   :  { %789 = vmatpush1.bf16.msra.mxu0 %v2309_v9  ;;  %657 = vmatprep.subr.bf16.mxu1 %v543_v10  ;;  %v181_v10 = vmul.f32 %v2385_v53, %v29_v48  ;;  %v415_v0 = vld [vmem:[%s3868_s0 + $0x1e8] sm:$0xff]  ;;  %v481_v3 = vld [vmem:[%s3868_s0 + $0x3f8] sm:$0xff]  ;;  %v22_v11 = vld [vmem:[%s3870_s2] sm:$0xff]  ;;  %v2505_v18 = vpack.c.bf16 %v476_v61, %v474_v54 }
  0x2b   :  { %790 = vmatprep.subr.bf16.mxu0 %v2321_v16  ;;  %802 = vmatprep.mubr.bf16.mxu0 %v297_v22  ;;  %v479_v2 = vld [vmem:[%s3868_s0 + $0x3e8] sm:$0xff]  ;;  %v28_v14 = vld [vmem:[%s3870_s2 + $0x30] sm:$0xff]  ;;  %v41_v40 = vld [vmem:[%s3870_s2 + $0x98] sm:$0xff] }
  0x2c   :  { %v295_v21 = vpack.c.bf16 %v181_v10, %v175_v6  ;;  %v414_v10 = vld [vmem:[%s3868_s0 + $0x1e0] sm:$0xff]  ;;  %v24_v22 = vld [vmem:[%s3870_s2 + $0x10] sm:$0xff]  ;;  %v483_v32 = vld [vmem:[%s3868_s0 + $0x408] sm:$0xff] }
  0x2d   :  { %658 = vmatpush1.bf16.msra.mxu1 %v542_v26  ;;  %v406_v26 = vld [vmem:[%s3868_s0 + $0x1a0] sm:$0xff]  ;;  %v480_v29 = vld [vmem:[%s3868_s0 + $0x3f0] sm:$0xff]  ;;  %v176_v45 = vmul.f32 %v2502_v15, %v24_v22 }
  0x2e   :  { %791 = vmatpush1.bf16.msra.mxu0 %v2350_v35  ;;  %659 = vmatprep.subr.bf16.mxu1 %v545_v36  ;;  %v413_v36 = vld [vmem:[%s3868_s0 + $0x1d8] sm:$0xff]  ;;  %v548_v44 = vpack.c.bf16 %v408_v28, %v406_v26  ;;  %v2517_v26 = vpack.c.bf16 %v481_v3, %v479_v2  ;;  %v478_v28 = vld [vmem:[%s3868_s0 + $0x3e0] sm:$0xff]  ;;  %v193_v3 = vmul.f32 %v2385_v53, %v41_v40 }
  0x2f   :  { %792 = vmatprep.subr.bf16.mxu0 %v2362_v42  ;;  %669 = vmatprep.mubr.bf16.mxu1 %v295_v21  ;;  %v551_v48 = vpack.c.bf16 %v413_v36, %v411_v34  ;;  %v416_v21 = vld [vmem:[%s3868_s0 + $0x1f0] sm:$0xff]  ;;  %v174_v34 = vmul.f32 %v2490_v5, %v22_v11  ;;  %v180_v36 = vmul.f32 %v2490_v5, %v28_v14  ;;  %v489_v11 = vld [vmem:[%s3868_s0 + $0x438] sm:$0xff]  ;;  %v34_v22 = vld [vmem:[%s3870_s2 + $0x60] sm:$0xff] }
  0x30   :  { %v2548_v54 = vpack.c.bf16 %v480_v29, %v478_v28  ;;  %v486_v29 = vld [vmem:[%s3868_s0 + $0x420] sm:$0xff]  ;;  %v53_v40 = vld [vmem:[%s3870_s2 + $0xf8] sm:$0xff] }
  0x31   :  { %660 = vmatpush1.bf16.msra.mxu1 %v544_v52  ;;  %v412_v52 = vld [vmem:[%s3868_s0 + $0x1d0] sm:$0xff] }
  0x32   :  { %793 = vmatpush1.bf16.msra.mxu0 %v2394_v58  ;;  %661 = vmatprep.subr.bf16.mxu1 %v547_v59  ;;  %v2472_v59 = vpack.c.bf16 %v477_v39, %v475_v37  ;;  %v550_v6 = vpack.c.bf16 %v412_v52, %v410_v50  ;;  %v485_v37 = vld [vmem:[%s3868_s0 + $0x418] sm:$0xff]  ;;  %v35_v39 = vld [vmem:[%s3870_s2 + $0x68] sm:$0xff] }
  0x33   :  { %794 = vmatprep.subr.bf16.mxu0 %v2396_v60  ;;  %v37_v50 = vld [vmem:[%s3870_s2 + $0x78] sm:$0xff]  ;;  %v43_v52 = vld [vmem:[%s3870_s2 + $0xa8] sm:$0xff]  ;;  %v587_v61 = vpack.c.bf16 %v485_v37, %v483_v32  ;;  %v187_v2 = vmul.f32 %v2385_v53, %v35_v39  ;;  %v36_v32 = vld [vmem:[%s3870_s2 + $0x70] sm:$0xff] }
  0x34   :  { %v189_v14 = vmul.f32 %v2391_v55, %v37_v50  ;;  %v488_v37 = vld [vmem:[%s3868_s0 + $0x430] sm:$0xff]  ;;  %v47_v39 = vld [vmem:[%s3870_s2 + $0xc8] sm:$0xff] }
  0x35   :  { %662 = vmatpush1.bf16.msra.mxu1 %v546_v20  ;;  %v553_v20 = vpack.c.bf16 %v417_v1, %v415_v0  ;;  %v482_v0 = vld [vmem:[%s3868_s0 + $0x400] sm:$0xff]  ;;  %v484_v1 = vld [vmem:[%s3868_s0 + $0x410] sm:$0xff]  ;;  %v491_v50 = vld [vmem:[%s3868_s0 + $0x448] sm:$0xff] }
  0x36   :  { %795 = vmatpush1.bf16.msra.mxu0 %v2428_v23  ;;  %663 = vmatprep.subr.bf16.mxu1 %v549_v24  ;;  %v30_v24 = vld [vmem:[%s3870_s2 + $0x40] sm:$0xff]  ;;  %v586_v28 = vpack.c.bf16 %v484_v1, %v482_v0  ;;  %v49_v1 = vld [vmem:[%s3870_s2 + $0xd8] sm:$0xff] }
  0x37   :  { %796 = vmatprep.subr.bf16.mxu0 %v2440_v31 }
  0x39   :  { %664 = vmatpush1.bf16.msra.mxu1 %v548_v44  ;;  %v552_v44 = vpack.c.bf16 %v416_v21, %v414_v10  ;;  %v487_v10 = vld [vmem:[%s3868_s0 + $0x428] sm:$0xff] }
  0x3a   :  { %797 = vmatpush1.bf16.msra.mxu0 %v2460_v46  ;;  %665 = vmatprep.subr.bf16.mxu1 %v551_v48  ;;  %v182_v48 = vmul.f32 %v2502_v15, %v30_v24  ;;  %v40_v24 = vld [vmem:[%s3870_s2 + $0x90] sm:$0xff] }
  0x3b   :  { %798 = vmatprep.subr.bf16.mxu0 %v2472_v59 }
  0x3c   :  { %v296_v21 = vpack.c.bf16 %v182_v48, %v176_v45  ;;  %v186_v45 = vmul.f32 %v2490_v5, %v34_v22  ;;  %v192_v48 = vmul.f32 %v2490_v5, %v40_v24  ;;  %v201_v22 = vmul.f32 %v2391_v55, %v49_v1  ;;  %v67_v1 = vld [vmem:[%s3870_s2 + $0x168] sm:$0xff] }
  0x3d   :  { %666 = vmatpush1.bf16.msra.mxu1 %v550_v6  ;;  %v294_v6 = vpack.c.bf16 %v180_v36, %v174_v34  ;;  %v42_v34 = vld [vmem:[%s3870_s2 + $0xa0] sm:$0xff]  ;;  %v589_v36 = vpack.c.bf16 %v489_v11, %v487_v10 }
  0x3e   :  { %799 = vmatpush1.bf16.msra.mxu0 %v2505_v18  ;;  %667 = vmatprep.subr.bf16.mxu1 %v553_v20  ;;  %v195_v20 = vmul.f32 %v2391_v55, %v43_v52  ;;  %v493_v52 = vld [vmem:[%s3868_s0 + $0x458] sm:$0xff]  ;;  %v194_v0 = vmul.f32 %v2502_v15, %v42_v34  ;;  %v490_v11 = vld [vmem:[%s3868_s0 + $0x440] sm:$0xff]  ;;  %v52_v34 = vld [vmem:[%s3870_s2 + $0xf0] sm:$0xff] }
  0x3f   :  { %800 = vmatprep.subr.bf16.mxu0 %v2517_v26  ;;  %v591_v10 = vpack.c.bf16 %v493_v52, %v491_v50  ;;  %v204_v52 = vmul.f32 %v2490_v5, %v52_v34 }
  0x41   :  { %668 = vmatpush1.bf16.msra.mxu1 %v552_v44  ;;  %v303_v44 = vpack.c.bf16 %v195_v20, %v189_v14  ;;  %v492_v14 = vld [vmem:[%s3868_s0 + $0x450] sm:$0xff]  ;;  %v300_v20 = vpack.c.bf16 %v192_v48, %v186_v45  ;;  %v65_v45 = vld [vmem:[%s3870_s2 + $0x158] sm:$0xff] }
  0x42   :  { %801 = vmatpush1.bf16.msra.mxu0 %v2548_v54  ;;  %1783 = vmatprep.subr.bf16.mxu1 %v2017_v7  ;;  %v301_v7 = vpack.c.bf16 %v193_v3, %v187_v2  ;;  %v55_v2 = vld [vmem:[%s3870_s2 + $0x108] sm:$0xff]  ;;  %v588_v3 = vpack.c.bf16 %v488_v37, %v486_v29  ;;  %v494_v29 = vld [vmem:[%s3868_s0 + $0x460] sm:$0xff] }
  0x43   :  { %903 = vmatprep.subr.bf16.mxu0 %v587_v61  ;;  %v188_v61 = vmul.f32 %v2502_v15, %v36_v32  ;;  %v207_v24 = vmul.f32 %v2391_v55, %v55_v2  ;;  %v46_v32 = vld [vmem:[%s3870_s2 + $0xc0] sm:$0xff] }
  0x44   :  { %670 = vmatmul.mubr.bf16.vlgmr.msra.gmra.mrb[0].mxu1 %v294_v6  ;;  %v199_v6 = vmul.f32 %v2385_v53, %v47_v39  ;;  %v54_v39 = vld [vmem:[%s3870_s2 + $0x100] sm:$0xff]  ;;  %v198_v50 = vmul.f32 %v2490_v5, %v46_v32  ;;  %v60_v32 = vld [vmem:[%s3870_s2 + $0x130] sm:$0xff] }
  0x45   :  { %803 = vmatmul.mubr.bf16.vlgmr.msra.gmra.mrb[0].mxu0 %v296_v21  ;;  %1799 = vmatpush1.bf16.msra.mxu1 %v2028_v12  ;;  %v205_v12 = vmul.f32 %v2385_v53, %v53_v40  ;;  %v497_v21 = vld [vmem:[%s3868_s0 + $0x478] sm:$0xff]  ;;  %v309_v48 = vpack.c.bf16 %v207_v24, %v201_v22  ;;  %v503_v22 = vld [vmem:[%s3868_s0 + $0x4a8] sm:$0xff] }
  0x46   :  { %904 = vmatpush1.bf16.msra.mxu0 %v586_v28  ;;  %1784 = vmatprep.subr.bf16.mxu1 %v2040_v17  ;;  %v495_v17 = vld [vmem:[%s3868_s0 + $0x468] sm:$0xff]  ;;  %v302_v28 = vpack.c.bf16 %v194_v0, %v188_v61  ;;  %v501_v61 = vld [vmem:[%s3868_s0 + $0x498] sm:$0xff] }
  0x47   :  { %905 = vmatprep.subr.bf16.mxu0 %v589_v36  ;;  %679 = vmatprep.mubr.bf16.mxu1 %v301_v7  ;;  %v590_v36 = vpack.c.bf16 %v492_v14, %v490_v11  ;;  %v307_v37 = vpack.c.bf16 %v205_v12, %v199_v6  ;;  %v48_v7 = vld [vmem:[%s3870_s2 + $0xd0] sm:$0xff]  ;;  %v593_v40 = vpack.c.bf16 %v497_v21, %v495_v17  ;;  %v61_v0 = vld [vmem:[%s3870_s2 + $0x138] sm:$0xff]  ;;  %v498_v14 = vld [vmem:[%s3868_s0 + $0x480] sm:$0xff] }
  0x48   :  { %812 = vmatprep.mubr.bf16.mxu0 %v303_v44  ;;  %v499_v44 = vld [vmem:[%s3868_s0 + $0x488] sm:$0xff]  ;;  %v200_v2 = vmul.f32 %v2502_v15, %v48_v7  ;;  %v219_v17 = vmul.f32 %v2391_v55, %v67_v1  ;;  %v306_v21 = vpack.c.bf16 %v204_v52, %v198_v50  ;;  %v509_v50 = vld [vmem:[%s3868_s0 + $0x4d8] sm:$0xff] }
  0x49   :  { %1800 = vmatpush1.bf16.msra.mxu1 %v2062_v25  ;;  %v496_v25 = vld [vmem:[%s3868_s0 + $0x470] sm:$0xff]  ;;  %v595_v11 = vpack.c.bf16 %v501_v61, %v499_v44  ;;  %v507_v44 = vld [vmem:[%s3868_s0 + $0x4c8] sm:$0xff]  ;;  %v73_v52 = vld [vmem:[%s3870_s2 + $0x198] sm:$0xff] }
  0x4a   :  { %906 = vmatpush1.bf16.msra.mxu0 %v588_v3  ;;  %1785 = vmatprep.subr.bf16.mxu1 %v2073_v30  ;;  %v59_v30 = vld [vmem:[%s3870_s2 + $0x128] sm:$0xff]  ;;  %v206_v3 = vmul.f32 %v2502_v15, %v54_v39  ;;  %v592_v6 = vpack.c.bf16 %v496_v25, %v494_v29  ;;  %v64_v29 = vld [vmem:[%s3870_s2 + $0x150] sm:$0xff]  ;;  %v502_v39 = vld [vmem:[%s3868_s0 + $0x4a0] sm:$0xff] }
  0x4b   :  { %907 = vmatprep.subr.bf16.mxu0 %v591_v10  ;;  %v211_v12 = vmul.f32 %v2385_v53, %v59_v30  ;;  %v217_v10 = vmul.f32 %v2385_v53, %v65_v45  ;;  %v71_v25 = vld [vmem:[%s3870_s2 + $0x188] sm:$0xff]  ;;  %v216_v45 = vmul.f32 %v2490_v5, %v64_v29 }
  0x4c   :  { %680 = vmatmul.mubr.bf16.gmra.mrb[4].mxu1 %v300_v20  ;;  %v213_v20 = vmul.f32 %v2391_v55, %v61_v0  ;;  %v308_v24 = vpack.c.bf16 %v206_v3, %v200_v2  ;;  %v79_v61 = vld [vmem:[%s3870_s2 + $0x1c8] sm:$0xff]  ;;  %v223_v1 = vmul.f32 %v2385_v53, %v71_v25 }
  0x4d   :  { %813 = vmatmul.mubr.bf16.gmra.mrb[4].mxu0 %v302_v28  ;;  %1801 = vmatpush1.bf16.msra.mxu1 %v2094_v38  ;;  %v500_v38 = vld [vmem:[%s3868_s0 + $0x490] sm:$0xff]  ;;  %v58_v28 = vld [vmem:[%s3870_s2 + $0x120] sm:$0xff] }
  0x4e   :  { %908 = vmatpush1.bf16.msra.mxu0 %v590_v36  ;;  %689 = vmatprep.mubr.bf16.mxu1 %v307_v37  ;;  %v594_v34 = vpack.c.bf16 %v500_v38, %v498_v14  ;;  %v313_v36 = vpack.c.bf16 %v217_v10, %v211_v12  ;;  %v77_v37 = vld [vmem:[%s3870_s2 + $0x1b8] sm:$0xff]  ;;  %v210_v30 = vmul.f32 %v2490_v5, %v58_v28  ;;  %v506_v10 = vld [vmem:[%s3868_s0 + $0x4c0] sm:$0xff]  ;;  %v72_v28 = vld [vmem:[%s3870_s2 + $0x190] sm:$0xff] }
  0x4f   :  { %909 = vmatprep.subr.bf16.mxu0 %v593_v40  ;;  %1786 = vmatprep.subr.bf16.mxu1 %v2106_v43  ;;  %v505_v43 = vld [vmem:[%s3868_s0 + $0x4b8] sm:$0xff]  ;;  %v315_v40 = vpack.c.bf16 %v219_v17, %v213_v20  ;;  %v229_v2 = vmul.f32 %v2385_v53, %v77_v37  ;;  %v599_v12 = vpack.c.bf16 %v509_v50, %v507_v44  ;;  %v511_v20 = vld [vmem:[%s3868_s0 + $0x4e8] sm:$0xff] }
  0x50   :  { %822 = vmatprep.mubr.bf16.mxu0 %v309_v48  ;;  %v597_v7 = vpack.c.bf16 %v505_v43, %v503_v22  ;;  %v212_v48 = vmul.f32 %v2502_v15, %v60_v32  ;;  %v231_v14 = vmul.f32 %v2391_v55, %v79_v61  ;;  %v312_v38 = vpack.c.bf16 %v216_v45, %v210_v30  ;;  %v513_v17 = vld [vmem:[%s3868_s0 + $0x4f8] sm:$0xff]  ;;  %v510_v22 = vld [vmem:[%s3868_s0 + $0x4e0] sm:$0xff]  ;;  %v83_v32 = vld [vmem:[%s3870_s2 + $0x1e8] sm:$0xff] }
  0x51   :  { %1802 = vmatpush1.bf16.msra.mxu1 %v2127_v51  ;;  %v66_v51 = vld [vmem:[%s3870_s2 + $0x160] sm:$0xff]  ;;  %v319_v43 = vpack.c.bf16 %v229_v2, %v223_v1  ;;  %v27_v37 = vld [vmem:[%s3870_s2 + $0x28] sm:$0xff]  ;;  %v517_v30 = vld [vmem:[%s3868_s0 + $0x518] sm:$0xff]  ;;  %v162_v45 = vsub.s32 4, %v2306_v8  ;;  %v235_v50 = vmul.f32 %v2385_v53, %v83_v32 }
  0x52   :  { %910 = vmatpush1.bf16.msra.mxu0 %v592_v6  ;;  %1787 = vmatprep.subr.bf16.mxu1 %v2139_v56  ;;  %v504_v56 = vld [vmem:[%s3868_s0 + $0x4b0] sm:$0xff]  ;;  %v218_v0 = vmul.f32 %v2502_v15, %v66_v51  ;;  %v166_v6 = vsub.s32 5, %v2306_v8  ;;  %v601_v51 = vpack.c.bf16 %v513_v17, %v511_v20  ;;  %v515_v44 = vld [vmem:[%s3868_s0 + $0x508] sm:$0xff]  ;;  %v26_v17 = vld [vmem:[%s3870_s2 + $0x20] sm:$0xff] }
  0x53   :  { %911 = vmatprep.subr.bf16.mxu0 %v595_v11  ;;  %v596_v3 = vpack.c.bf16 %v504_v56, %v502_v39  ;;  %v225_v11 = vmul.f32 %v2391_v55, %v73_v52  ;;  %v1398_v8 = vld [vmem:[%s3871_s3 + $0x8] sm:$0xff]  ;;  %v603_v2 = vpack.c.bf16 %v517_v30, %v515_v44  ;;  %v88_v20 = vld [vmem:[%s3870_s2 + $0x210] sm:$0xff] }
  0x54   :  { %690 = vmatmul.mubr.bf16.gmra.mrb[8].mxu1 %v306_v21  ;;  %v314_v21 = vpack.c.bf16 %v218_v0, %v212_v48  ;;  %1424 = vperm.xlu1 %1900, %v1398_v8   ;;  %v240_v32 = vmul.f32 %v2490_v5, %v88_v20  ;;  %v1400_v8 = vld [vmem:[%s3871_s3 + $0x18] sm:$0xff] }
  0x55   :  { %823 = vmatmul.mubr.bf16.gmra.mrb[8].mxu0 %v308_v24  ;;  %1803 = vmatpush1.bf16.msra.mxu1 %v2157_v63  ;;  %v508_v63 = vld [vmem:[%s3868_s0 + $0x4d0] sm:$0xff]  ;;  %v321_v25 = vpack.c.bf16 %v231_v14, %v225_v11  ;;  %v518_v14 = vld [vmem:[%s3868_s0 + $0x520] sm:$0xff] }
  0x56   :  { %912 = vmatpush1.bf16.msra.mxu0 %v594_v34  ;;  %699 = vmatprep.mubr.bf16.mxu1 %v313_v36  ;;  %v76_v24 = vld [vmem:[%s3870_s2 + $0x1b0] sm:$0xff]  ;;  %v598_v29 = vpack.c.bf16 %v508_v63, %v506_v10  ;;  %v89_v34 = vld [vmem:[%s3870_s2 + $0x218] sm:$0xff]  ;;  %v2772_v36 = vrot.slane %v2379_v49, %v166_v6  ;;  %v2816_v63 = vrot.slane %v2379_v49, %v162_v45  ;;  %v94_v45 = vld [vmem:[%s3870_s2 + $0x240] sm:$0xff] }
  0x57   :  { %913 = vmatprep.subr.bf16.mxu0 %v597_v7  ;;  %832 = vmatprep.mubr.bf16.mxu0 %v315_v40  ;;  %v33_v7 = vld [vmem:[%s3870_s2 + $0x58] sm:$0xff]  ;;  %v228_v56 = vmul.f32 %v2490_v5, %v76_v24  ;;  %v224_v40 = vmul.f32 %v2502_v15, %v72_v28  ;;  %v241_v52 = vmul.f32 %v2385_v53, %v89_v34  ;;  %v516_v6 = vld [vmem:[%s3868_s0 + $0x510] sm:$0xff] }
  0x58   :  { %1788 = vmatprep.subr.bf16.mxu1 %v2169_v4  ;;  %v70_v4 = vld [vmem:[%s3870_s2 + $0x180] sm:$0xff]  ;;  %v179_v0 = vmul.f32 %v2772_v36, %v27_v37  ;;  %v185_v1 = vmul.f32 %v2772_v36, %v33_v7  ;;  %v521_v10 = vld [vmem:[%s3868_s0 + $0x538] sm:$0xff]  ;;  %v520_v28 = vld [vmem:[%s3868_s0 + $0x530] sm:$0xff]  ;;  %v178_v34 = vmul.f32 %v2816_v63, %v26_v17 }
  0x59   :  { %1804 = vmatpush1.bf16.msra.mxu1 %v2187_v13  ;;  %v78_v13 = vld [vmem:[%s3870_s2 + $0x1c0] sm:$0xff]  ;;  %v222_v39 = vmul.f32 %v2490_v5, %v70_v4  ;;  %v101_v4 = vld [vmem:[%s3870_s2 + $0x278] sm:$0xff]  ;;  %v604_v37 = vpack.c.bf16 %v520_v28, %v518_v14 }
  0x5a   :  { %914 = vmatpush1.bf16.msra.mxu0 %v596_v3  ;;  %1789 = vmatprep.subr.bf16.mxu1 %v2199_v19  ;;  %v512_v19 = vld [vmem:[%s3868_s0 + $0x4f0] sm:$0xff]  ;;  %v230_v48 = vmul.f32 %v2502_v15, %v78_v13  ;;  %v514_v3 = vld [vmem:[%s3868_s0 + $0x500] sm:$0xff] }
  0x5b   :  { %915 = vmatprep.subr.bf16.mxu0 %v599_v12  ;;  %v600_v61 = vpack.c.bf16 %v512_v19, %v510_v22  ;;  %v519_v12 = vld [vmem:[%s3868_s0 + $0x528] sm:$0xff]  ;;  %v602_v49 = vpack.c.bf16 %v516_v6, %v514_v3  ;;  %v32_v22 = vld [vmem:[%s3870_s2 + $0x50] sm:$0xff]  ;;  %v253_v19 = vmul.f32 %v2385_v53, %v101_v4 }
  0x5c   :  { %700 = vmatmul.mubr.bf16.gmra.mrb[12].mxu1 %v312_v38  ;;  %v320_v11 = vpack.c.bf16 %v230_v48, %v224_v40  ;;  %v325_v38 = vpack.c.bf16 %v241_v52, %v235_v50  ;;  %v605_v24 = vpack.c.bf16 %v521_v10, %v519_v12  ;;  %v100_v48 = vld [vmem:[%s3870_s2 + $0x270] sm:$0xff]  ;;  %v38_v50 = vld [vmem:[%s3870_s2 + $0x80] sm:$0xff]  ;;  %v107_v52 = vld [vmem:[%s3870_s2 + $0x2a8] sm:$0xff] }
  0x5d   :  { %833 = vmatmul.mubr.bf16.gmra.mrb[12].mxu0 %v314_v21  ;;  %709 = vmatprep.mubr.bf16.mxu1 %v319_v43  ;;  %v299_v21 = vpack.c.bf16 %v185_v1, %v179_v0  ;;  %v95_v43 = vld [vmem:[%s3870_s2 + $0x248] sm:$0xff]  ;;  %v57_v1 = vld [vmem:[%s3870_s2 + $0x118] sm:$0xff]  ;;  %v252_v3 = vmul.f32 %v2490_v5, %v100_v48  ;;  %v190_v6 = vmul.f32 %v2816_v63, %v38_v50 }
  0x5e   :  { %916 = vmatpush1.bf16.msra.mxu0 %v598_v29  ;;  %1805 = vmatpush1.bf16.msra.mxu1 %v2217_v27  ;;  %v318_v27 = vpack.c.bf16 %v228_v56, %v222_v39  ;;  %v45_v29 = vld [vmem:[%s3870_s2 + $0xb8] sm:$0xff]  ;;  %v1397_v56 = vld [vmem:[%s3871_s3] sm:$0xff]  ;;  %v51_v0 = vld [vmem:[%s3870_s2 + $0xe8] sm:$0xff]  ;;  %v259_v12 = vmul.f32 %v2385_v53, %v107_v52 }
  0x5f   :  { %917 = vmatprep.subr.bf16.mxu0 %v601_v51  ;;  %842 = vmatprep.mubr.bf16.mxu0 %v321_v25  ;;  %v184_v51 = vmul.f32 %v2816_v63, %v32_v22  ;;  %v1399_v25 = vld [vmem:[%s3871_s3 + $0x10] sm:$0xff]  ;;  %v197_v39 = vmul.f32 %v2772_v36, %v45_v29 }
  0x60   :  { %1790 = vmatprep.subr.bf16.mxu1 %v2229_v33  ;;  %v82_v33 = vld [vmem:[%s3870_s2 + $0x1e0] sm:$0xff]  ;;  %1429 = vperm.xlu1 %1900, %v1399_v25  }
  0x61   :  { %v234_v13 = vmul.f32 %v2490_v5, %v82_v33  ;;  %v298_v44 = vpack.c.bf16 %v184_v51, %v178_v34  ;;  %1419 = vperm.xlu0 %1899, %v1397_v56  }
  0x62   :  { %918 = vmatpush1.bf16.msra.mxu0 %v600_v61  ;;  %1806 = vmatpush1.bf16.msra.mxu1 %v2247_v41  ;;  %v39_v41 = vld [vmem:[%s3870_s2 + $0x88] sm:$0xff]  ;;  %v113_v61 = vld [vmem:[%s3870_s2 + $0x2d8] sm:$0xff] }
  0x63   :  { %919 = vmatprep.subr.bf16.mxu0 %v603_v2  ;;  %1791 = vmatprep.subr.bf16.mxu1 %v2259_v47  ;;  %v247_v47 = vmul.f32 %v2385_v53, %v95_v43  ;;  %v191_v7 = vmul.f32 %v2772_v36, %v39_v41  ;;  %v324_v40 = vpack.c.bf16 %v240_v32, %v234_v13 }
  0x64   :  { %710 = vmatmul.mubr.bf16.gmra.mrb[16].mxu1 %v318_v27  ;;  %v246_v2 = vmul.f32 %v2490_v5, %v94_v45  ;;  %v265_v10 = vmul.f32 %v2385_v53, %v113_v61 }
  0x65   :  { %843 = vmatmul.mubr.bf16.gmra.mrb[16].mxu0 %v320_v11  ;;  %719 = vmatprep.mubr.bf16.mxu1 %v325_v38  ;;  %v331_v30 = vpack.c.bf16 %v253_v19, %v247_v47 }
  0x66   :  { %920 = vmatpush1.bf16.msra.mxu0 %v602_v49  ;;  %1773 = vmatprep.mubr.msk.bf16.mxu0 %vm606_vm0, %v299_v21 }
  0x67   :  { %921 = vmatprep.subr.bf16.mxu0 %v605_v24  ;;  %1807 = vmatpush1.bf16.msra.mxu1 %v2277_v57  ;;  %v305_v57 = vpack.c.bf16 %v197_v39, %v191_v7 }
  0x68   :  { %1792 = vmatprep.subr.bf16.mxu1 %v2289_v62  ;;  %v44_v62 = vld [vmem:[%s3870_s2 + $0xb0] sm:$0xff] }
  0x69   :  { %v196_v27 = vmul.f32 %v2816_v63, %v44_v62 }
  0x6a   :  { %922 = vmatpush1.bf16.msra.mxu0 %v604_v37 }
  0x6b   :  { %1808 = vmatpush1.bf16.msra.mxu1 %v2309_v9  ;;  %v1406_v9 = vld [vmem:[%s3871_s3 + $0x48] sm:$0xff] }
  0x6c   :  { %720 = vmatmul.mubr.bf16.gmra.mrb[20].mxu1 %v324_v40  ;;  %1793 = vmatprep.subr.bf16.mxu1 %v2321_v16 }
  0x6d   :  { %936 = vmatmul.mubr.bf16.vlgmr.msra.gmra.mrb[0].mxu0 %v298_v44  ;;  %729 = vmatprep.mubr.bf16.mxu1 %v331_v30 }
  0x6e   :  { %10 = vsyncpa [#allocation3], 0  ;;  %1774 = vmatprep.mubr.msk.bf16.mxu0 %vm606_vm0, %v305_v57  ;;  %v203_v11 = vmul.f32 %v2772_v36, %v51_v0  ;;  %v209_v14 = vmul.f32 %v2772_v36, %v57_v1  ;;  %1434 = vperm.xlu1 %1900, %v1400_v8   ;;  %v1401_v16 = vld [vmem:[%s3871_s3 + $0x20] sm:$0xff]  ;;  %v330_v38 = vpack.c.bf16 %v252_v3, %v246_v2  ;;  %v1408_v33 = vld [vmem:[%s3871_s3 + $0x58] sm:$0xff]  ;;  %vm1036_vm1 = vcmask 556032  }
  0x6f   :  { %1809 = vmatpush1.bf16.msra.mxu1 %v2350_v35  ;;  %1464 = vperm.xlu0 %1899, %v1406_v9   ;;  %v304_v20 = vpack.c.bf16 %v196_v27, %v190_v6  ;;  %v337_v17 = vpack.c.bf16 %v265_v10, %v259_v12  ;;  %v106_v49 = vld [vmem:[%s3870_s2 + $0x2a0] sm:$0xff]  ;;  %v112_v35 = vld [vmem:[%s3870_s2 + $0x2d0] sm:$0xff]  ;;  %v119_v43 = vld [vmem:[%s3870_s2 + $0x308] sm:$0xff] }
  0x70   :  { %1794 = vmatprep.subr.bf16.mxu1 %v2362_v42  ;;  %v50_v21 = vld [vmem:[%s3870_s2 + $0xe0] sm:$0xff]  ;;  %v311_v22 = vpack.c.bf16 %v209_v14, %v203_v11  ;;  %v56_v42 = vld [vmem:[%s3870_s2 + $0x110] sm:$0xff]  ;;  %v125_v4 = vld [vmem:[%s3870_s2 + $0x338] sm:$0xff]  ;;  %v258_v29 = vmul.f32 %v2490_v5, %v106_v49  ;;  %v264_v13 = vmul.f32 %v2490_v5, %v112_v35  ;;  %v271_v51 = vmul.f32 %v2385_v53, %v119_v43 }
  0x71   :  { %v63_v24 = vld [vmem:[%s3870_s2 + $0x148] sm:$0xff]  ;;  %v69_v28 = vld [vmem:[%s3870_s2 + $0x178] sm:$0xff]  ;;  %v208_v34 = vmul.f32 %v2816_v63, %v56_v42  ;;  %v277_v47 = vmul.f32 %v2385_v53, %v125_v4  ;;  %v118_v40 = vld [vmem:[%s3870_s2 + $0x300] sm:$0xff] }
  0x72   :  { %1439 = vperm.xlu1 %1900, %v1401_v16   ;;  %v1402_v41 = vld [vmem:[%s3871_s3 + $0x28] sm:$0xff]  ;;  %v215_v19 = vmul.f32 %v2772_v36, %v63_v24  ;;  %v221_v25 = vmul.f32 %v2772_v36, %v69_v28  ;;  %v336_v37 = vpack.c.bf16 %v264_v13, %v258_v29  ;;  %v1412_v7 = vld [vmem:[%s3871_s3 + $0x78] sm:$0xff]  ;;  %v62_v44 = vld [vmem:[%s3870_s2 + $0x140] sm:$0xff]  ;;  %v270_v52 = vmul.f32 %v2490_v5, %v118_v40 }
  0x73   :  { %1810 = vmatpush1.bf16.msra.mxu1 %v2394_v58  ;;  %1474 = vperm.xlu0 %1899, %v1408_v33   ;;  %v202_v58 = vmul.f32 %v2816_v63, %v50_v21  ;;  %v1410_v32 = vld [vmem:[%s3871_s3 + $0x68] sm:$0xff]  ;;  %v343_v56 = vpack.c.bf16 %v277_v47, %v271_v51  ;;  %v137_v48 = vld [vmem:[%s3870_s2 + $0x398] sm:$0xff]  ;;  %v130_v10 = vld [vmem:[%s3870_s2 + $0x360] sm:$0xff] }
  0x74   :  { %730 = vmatmul.mubr.bf16.gmra.mrb[24].mxu1 %v330_v38  ;;  %1795 = vmatprep.subr.bf16.mxu1 %v2396_v60  ;;  %v1403_v60 = vld [vmem:[%s3871_s3 + $0x30] sm:$0xff]  ;;  %v317_v30 = vpack.c.bf16 %v221_v25, %v215_v19  ;;  %v131_v45 = vld [vmem:[%s3870_s2 + $0x368] sm:$0xff]  ;;  %v81_v57 = vld [vmem:[%s3870_s2 + $0x1d8] sm:$0xff]  ;;  %v289_v2 = vmul.f32 %v2385_v53, %v137_v48  ;;  %v282_v49 = vmul.f32 %v2490_v5, %v130_v10 }
  0x75   :  { %946 = vmatmul.mubr.bf16.gmra.mrb[4].mxu0 %v304_v20  ;;  %739 = vmatprep.mubr.bf16.mxu1 %v337_v17  ;;  %v310_v39 = vpack.c.bf16 %v208_v34, %v202_v58  ;;  %v75_v50 = vld [vmem:[%s3870_s2 + $0x1a8] sm:$0xff]  ;;  %v1404_v62 = vld [vmem:[%s3871_s3 + $0x38] sm:$0xff]  ;;  %v283_v8 = vmul.f32 %v2385_v53, %v131_v45  ;;  %v233_v6 = vmul.f32 %v2772_v36, %v81_v57  ;;  %v74_v11 = vld [vmem:[%s3870_s2 + $0x1a0] sm:$0xff] }
  0x76   :  { %1775 = vmatprep.mubr.msk.bf16.mxu0 %vm606_vm0, %v311_v22  ;;  %1444 = vperm.xlu1 %1900, %v1402_v41   ;;  %v1414_v0 = vld [vmem:[%s3871_s3 + $0x88] sm:$0xff]  ;;  %v227_v3 = vmul.f32 %v2772_v36, %v75_v50  ;;  %v1416_v53 = vld [vmem:[%s3871_s3 + $0x98] sm:$0xff]  ;;  %v1407_v17 = vld [vmem:[%s3871_s3 + $0x50] sm:$0xff] }
  0x77   :  { %1811 = vmatpush1.bf16.msra.mxu1 %v2428_v23  ;;  %1484 = vperm.xlu0 %1899, %v1410_v32   ;;  %v124_v23 = vld [vmem:[%s3870_s2 + $0x330] sm:$0xff]  ;;  %v349_v12 = vpack.c.bf16 %v289_v2, %v283_v8  ;;  %v85_v16 = vld [vmem:[%s3870_s2 + $0x1f8] sm:$0xff]  ;;  %v91_v38 = vld [vmem:[%s3870_s2 + $0x228] sm:$0xff] }
  0x78   :  { %1796 = vmatprep.subr.bf16.mxu1 %v2440_v31  ;;  %v68_v31 = vld [vmem:[%s3870_s2 + $0x170] sm:$0xff]  ;;  %v276_v61 = vmul.f32 %v2490_v5, %v124_v23  ;;  %v323_v14 = vpack.c.bf16 %v233_v6, %v227_v3  ;;  %v87_v33 = vld [vmem:[%s3870_s2 + $0x208] sm:$0xff]  ;;  %v93_v20 = vld [vmem:[%s3870_s2 + $0x238] sm:$0xff]  ;;  %v237_v42 = vmul.f32 %v2391_v55, %v85_v16  ;;  %v243_v43 = vmul.f32 %v2391_v55, %v91_v38 }
  0x79   :  { %v220_v1 = vmul.f32 %v2816_v63, %v68_v31  ;;  %v1558_v21 = vld [vmem:[%s3872_s4 + $0x8] sm:$0xff]  ;;  %v239_v4 = vmul.f32 %v2772_v36, %v87_v33  ;;  %v1409_v24 = vld [vmem:[%s3871_s3 + $0x60] sm:$0xff]  ;;  %v1560_v41 = vld [vmem:[%s3872_s4 + $0x18] sm:$0xff] }
  0x7a   :  { %1449 = vperm.xlu1 %1900, %v1403_v60   ;;  %v342_v9 = vpack.c.bf16 %v276_v61, %v270_v52  ;;  %v327_v13 = vpack.c.bf16 %v243_v43, %v237_v42  ;;  %v84_v58 = vld [vmem:[%s3870_s2 + $0x1f0] sm:$0xff]  ;;  %v90_v32 = vld [vmem:[%s3870_s2 + $0x220] sm:$0xff]  ;;  %v97_v19 = vld [vmem:[%s3870_s2 + $0x258] sm:$0xff] }
  0x7b   :  { %1812 = vmatpush1.bf16.msra.mxu1 %v2460_v46  ;;  %1494 = vperm.xlu0 %1899, %v1412_v7   ;;  %v214_v46 = vmul.f32 %v2816_v63, %v62_v44  ;;  %v86_v34 = vld [vmem:[%s3870_s2 + $0x200] sm:$0xff]  ;;  %v92_v47 = vld [vmem:[%s3870_s2 + $0x230] sm:$0xff]  ;;  %v103_v25 = vld [vmem:[%s3870_s2 + $0x288] sm:$0xff] }
  0x7c   :  { %740 = vmatmul.mubr.bf16.gmra.mrb[28].mxu1 %v336_v37  ;;  %1797 = vmatprep.subr.bf16.mxu1 %v2472_v59  ;;  %v1405_v59 = vld [vmem:[%s3871_s3 + $0x40] sm:$0xff]  ;;  %v99_v60 = vld [vmem:[%s3870_s2 + $0x268] sm:$0xff]  ;;  %v105_v37 = vld [vmem:[%s3870_s2 + $0x298] sm:$0xff]  ;;  %v238_v40 = vmul.f32 %v2816_v63, %v86_v34  ;;  %v244_v44 = vmul.f32 %v2816_v63, %v92_v47  ;;  %v255_v31 = vmul.f32 %v2391_v55, %v103_v25 }
  0x7d   :  { %956 = vmatmul.mubr.bf16.gmra.mrb[8].mxu0 %v310_v39  ;;  %749 = vmatprep.mubr.bf16.mxu1 %v343_v56  ;;  %v316_v27 = vpack.c.bf16 %v220_v1, %v214_v46  ;;  %v1411_v7 = vld [vmem:[%s3871_s3 + $0x70] sm:$0xff]  ;;  %v236_v39 = vmul.f32 %v2502_v15, %v84_v58  ;;  %v242_v56 = vmul.f32 %v2502_v15, %v90_v32  ;;  %v1562_v23 = vld [vmem:[%s3872_s4 + $0x28] sm:$0xff]  ;;  %v1413_v50 = vld [vmem:[%s3871_s3 + $0x80] sm:$0xff] }
  0x7e   :  { %1776 = vmatprep.mubr.msk.bf16.mxu0 %vm606_vm0, %v317_v30  ;;  %1454 = vperm.xlu1 %1900, %v1404_v62   ;;  %v249_v30 = vmul.f32 %v2391_v55, %v97_v19  ;;  %v251_v45 = vmul.f32 %v2772_v36, %v99_v60  ;;  %v257_v48 = vmul.f32 %v2772_v36, %v105_v37  ;;  %v1564_v62 = vld [vmem:[%s3872_s4 + $0x38] sm:$0xff]  ;;  %v96_v46 = vld [vmem:[%s3870_s2 + $0x250] sm:$0xff]  ;;  %v98_v1 = vld [vmem:[%s3870_s2 + $0x260] sm:$0xff] }
  0x7f   :  { %1813 = vmatpush1.bf16.msra.mxu1 %v2505_v18  ;;  %1504 = vperm.xlu0 %1899, %v1414_v0   ;;  %v136_v18 = vld [vmem:[%s3870_s2 + $0x390] sm:$0xff]  ;;  %v326_v57 = vpack.c.bf16 %v242_v56, %v236_v39  ;;  %v328_v52 = vpack.c.bf16 %v244_v44, %v238_v40  ;;  %v102_v0 = vld [vmem:[%s3870_s2 + $0x280] sm:$0xff]  ;;  %v109_v3 = vld [vmem:[%s3870_s2 + $0x2b8] sm:$0xff]  ;;  %v250_v10 = vmul.f32 %v2816_v63, %v98_v1 }
  0x80   :  { %1798 = vmatprep.subr.bf16.mxu1 %v2517_v26  ;;  %v80_v26 = vld [vmem:[%s3870_s2 + $0x1d0] sm:$0xff]  ;;  %v288_v35 = vmul.f32 %v2490_v5, %v136_v18  ;;  %v245_v5 = vmul.f32 %v2772_v36, %v93_v20  ;;  %v333_v61 = vpack.c.bf16 %v255_v31, %v249_v30  ;;  %v335_v8 = vpack.c.bf16 %v257_v48, %v251_v45  ;;  %v115_v6 = vld [vmem:[%s3870_s2 + $0x2e8] sm:$0xff]  ;;  %v1557_v33 = vld [vmem:[%s3872_s4] sm:$0xff] }
  0x81   :  { %v232_v22 = vmul.f32 %v2816_v63, %v80_v26  ;;  %v104_v2 = vld [vmem:[%s3870_s2 + $0x290] sm:$0xff]  ;;  %v1566_v18 = vld [vmem:[%s3872_s4 + $0x48] sm:$0xff]  ;;  %v267_v26 = vmul.f32 %v2391_v55, %v115_v6  ;;  %v1561_v60 = vld [vmem:[%s3872_s4 + $0x20] sm:$0xff] }
  0x82   :  { %1459 = vperm.xlu1 %1900, %v1405_v59   ;;  %v348_v28 = vpack.c.bf16 %v288_v35, %v282_v49  ;;  %v329_v51 = vpack.c.bf16 %v245_v5, %v239_v4  ;;  %v111_v59 = vld [vmem:[%s3870_s2 + $0x2c8] sm:$0xff]  ;;  %v116_v43 = vld [vmem:[%s3870_s2 + $0x2f0] sm:$0xff]  ;;  %v121_v4 = vld [vmem:[%s3870_s2 + $0x318] sm:$0xff] }
  0x83   :  { %1814 = vmatpush1.bf16.msra.mxu1 %v2548_v54  ;;  %1514 = vperm.xlu0 %1899, %v1416_v53   ;;  %v226_v54 = vmul.f32 %v2816_v63, %v74_v11  ;;  %v1415_v53 = vld [vmem:[%s3871_s3 + $0x90] sm:$0xff]  ;;  %v256_v11 = vmul.f32 %v2816_v63, %v104_v2  ;;  %v263_v16 = vmul.f32 %v2772_v36, %v111_v59  ;;  %v127_v5 = vld [vmem:[%s3870_s2 + $0x348] sm:$0xff]  ;;  %v122_v44 = vld [vmem:[%s3870_s2 + $0x320] sm:$0xff] }
  0x84   :  { %750 = vmatmul.mubr.bf16.gmra.mrb[32].mxu1 %v342_v9  ;;  %v117_v9 = vld [vmem:[%s3870_s2 + $0x2f8] sm:$0xff]  ;;  %v1570_v32 = vld [vmem:[%s3872_s4 + $0x68] sm:$0xff]  ;;  %v268_v34 = vmul.f32 %v2816_v63, %v116_v43  ;;  %v279_v47 = vmul.f32 %v2391_v55, %v127_v5  ;;  %v120_v40 = vld [vmem:[%s3870_s2 + $0x310] sm:$0xff] }
  0x85   :  { %966 = vmatmul.mubr.bf16.gmra.mrb[12].mxu0 %v316_v27  ;;  %759 = vmatprep.mubr.bf16.mxu1 %v349_v12  ;;  %v322_v29 = vpack.c.bf16 %v232_v22, %v226_v54  ;;  %v248_v27 = vmul.f32 %v2502_v15, %v96_v46  ;;  %v254_v12 = vmul.f32 %v2502_v15, %v102_v0  ;;  %v108_v54 = vld [vmem:[%s3870_s2 + $0x2b0] sm:$0xff]  ;;  %v110_v22 = vld [vmem:[%s3870_s2 + $0x2c0] sm:$0xff]  ;;  %v133_v45 = vld [vmem:[%s3870_s2 + $0x378] sm:$0xff] }
  0x86   :  { %1777 = vmatprep.mubr.msk.bf16.mxu0 %vm606_vm0, %v323_v14  ;;  %1469 = vperm.xlu1 %1900, %v1407_v17   ;;  %v261_v14 = vmul.f32 %v2391_v55, %v109_v3  ;;  %v269_v38 = vmul.f32 %v2772_v36, %v117_v9  ;;  %v1568_v17 = vld [vmem:[%s3872_s4 + $0x58] sm:$0xff]  ;;  %v334_v49 = vpack.c.bf16 %v256_v11, %v250_v10  ;;  %v128_v31 = vld [vmem:[%s3870_s2 + $0x350] sm:$0xff]  ;;  %v139_v48 = vld [vmem:[%s3870_s2 + $0x3a8] sm:$0xff] }
  0x87   :  { %1584 = vperm.xlu0 %1899, %v1558_v21   ;;  %v332_v20 = vpack.c.bf16 %v254_v12, %v248_v27  ;;  %v114_v21 = vld [vmem:[%s3870_s2 + $0x2e0] sm:$0xff]  ;;  %v262_v58 = vmul.f32 %v2816_v63, %v110_v22  ;;  %v274_v46 = vmul.f32 %v2816_v63, %v122_v44  ;;  %v280_v0 = vmul.f32 %v2816_v63, %v128_v31  ;;  %v132_v27 = vld [vmem:[%s3870_s2 + $0x370] sm:$0xff] }
  0x88   :  { %v339_v35 = vpack.c.bf16 %v267_v26, %v261_v14  ;;  %v341_v42 = vpack.c.bf16 %v269_v38, %v263_v16  ;;  %v285_v1 = vmul.f32 %v2391_v55, %v133_v45  ;;  %v1565_v6 = vld [vmem:[%s3872_s4 + $0x40] sm:$0xff]  ;;  %v140_v10 = vld [vmem:[%s3870_s2 + $0x3b0] sm:$0xff]  ;;  %v284_v11 = vmul.f32 %v2502_v15, %v132_v27 }
  0x89   :  { %v340_v39 = vpack.c.bf16 %v268_v34, %v262_v58  ;;  %v346_v9 = vpack.c.bf16 %v280_v0, %v274_v46  ;;  %v292_v16 = vmul.f32 %v2816_v63, %v140_v10  ;;  %v1569_v38 = vld [vmem:[%s3872_s4 + $0x60] sm:$0xff] }
  0x8a   :  { %1479 = vperm.xlu1 %1900, %v1409_v24   ;;  %v123_v24 = vld [vmem:[%s3870_s2 + $0x328] sm:$0xff] }
  0x8b   :  { %1594 = vperm.xlu0 %1899, %v1560_v41   ;;  %v1559_v41 = vld [vmem:[%s3872_s4 + $0x10] sm:$0xff]  ;;  %v275_v19 = vmul.f32 %v2772_v36, %v123_v24 }
  0x8c   :  { %760 = vmatmul.mubr.bf16.gmra.mrb[36].mxu1 %v348_v28  ;;  %v129_v28 = vld [vmem:[%s3870_s2 + $0x358] sm:$0xff] }
  0x8d   :  { %976 = vmatmul.mubr.bf16.gmra.mrb[16].mxu0 %v322_v29  ;;  %852 = vmatprep.mubr.bf16.mxu1 %v327_v13  ;;  %v260_v29 = vmul.f32 %v2502_v15, %v108_v54  ;;  %v266_v13 = vmul.f32 %v2502_v15, %v114_v21  ;;  %v281_v25 = vmul.f32 %v2772_v36, %v129_v28 }
  0x8e   :  { %1778 = vmatprep.mubr.msk.bf16.mxu0 %vm606_vm0, %v329_v51  ;;  %1489 = vperm.xlu1 %1900, %v1411_v7   ;;  %v273_v51 = vmul.f32 %v2391_v55, %v121_v4  ;;  %v1572_v7 = vld [vmem:[%s3872_s4 + $0x78] sm:$0xff] }
  0x8f   :  { %1604 = vperm.xlu0 %1899, %v1562_v23   ;;  %v338_v37 = vpack.c.bf16 %v266_v13, %v260_v29  ;;  %v126_v23 = vld [vmem:[%s3870_s2 + $0x340] sm:$0xff]  ;;  %v347_v30 = vpack.c.bf16 %v281_v25, %v275_v19 }
  0x90   :  { %v345_v56 = vpack.c.bf16 %v279_v47, %v273_v51 }
  0x92   :  { %1499 = vperm.xlu1 %1900, %v1413_v50   ;;  %v135_v50 = vld [vmem:[%s3870_s2 + $0x388] sm:$0xff] }
  0x93   :  { %1614 = vperm.xlu0 %1899, %v1564_v62   ;;  %v1563_v62 = vld [vmem:[%s3872_s4 + $0x30] sm:$0xff]  ;;  %v287_v2 = vmul.f32 %v2772_v36, %v135_v50 }
  0x94   :  { %853 = vmatmul.mubr.bf16.vlgmr.msra.gmra.mrb[20].mxu1 %v326_v57  ;;  %v141_v57 = vld [vmem:[%s3870_s2 + $0x3b8] sm:$0xff] }
  0x95   :  { %986 = vmatmul.mubr.bf16.gmra.mrb[20].mxu0 %v328_v52  ;;  %862 = vmatprep.mubr.bf16.mxu1 %v333_v61  ;;  %v272_v52 = vmul.f32 %v2502_v15, %v120_v40  ;;  %v278_v61 = vmul.f32 %v2502_v15, %v126_v23  ;;  %v293_v3 = vmul.f32 %v2772_v36, %v141_v57  ;;  %v134_v36 = vld [vmem:[%s3870_s2 + $0x380] sm:$0xff] }
  0x96   :  { %1779 = vmatprep.mubr.msk.bf16.mxu0 %vm606_vm0, %v335_v8  ;;  %1509 = vperm.xlu1 %1900, %v1415_v53   ;;  %v291_v8 = vmul.f32 %v2391_v55, %v139_v48  ;;  %v138_v55 = vld [vmem:[%s3870_s2 + $0x3a0] sm:$0xff]  ;;  %v286_v26 = vmul.f32 %v2816_v63, %v134_v36 }
  0x97   :  { %1624 = vperm.xlu0 %1899, %v1566_v18   ;;  %v344_v59 = vpack.c.bf16 %v278_v61, %v272_v52  ;;  %v353_v12 = vpack.c.bf16 %v293_v3, %v287_v2  ;;  %v1567_v18 = vld [vmem:[%s3872_s4 + $0x50] sm:$0xff]  ;;  %v290_v14 = vmul.f32 %v2502_v15, %v138_v55 }
  0x98   :  { %v351_v53 = vpack.c.bf16 %v291_v8, %v285_v1  ;;  %v1571_v15 = vld [vmem:[%s3872_s4 + $0x70] sm:$0xff] }
  0x9a   :  { %1579 = vperm.xlu1 %1900, %v1557_v33   ;;  %v350_v33 = vpack.c.bf16 %v290_v14, %v284_v11 }
  0x9b   :  { %1634 = vperm.xlu0 %1899, %v1568_v17  }
  0x9c   :  { %863 = vmatmul.mubr.bf16.gmra.mrb[24].mxu1 %v332_v20  ;;  %v352_v20 = vpack.c.bf16 %v292_v16, %v286_v26 }
  0x9d   :  { %996 = vmatmul.mubr.bf16.gmra.mrb[24].mxu0 %v334_v49  ;;  %872 = vmatprep.mubr.bf16.mxu1 %v339_v35 }
  0x9e   :  { %1780 = vmatprep.mubr.msk.bf16.mxu0 %vm606_vm0, %v341_v42  ;;  %1589 = vperm.xlu1 %1900, %v1559_v41  }
  0x9f   :  { %1644 = vperm.xlu0 %1899, %v1570_v32  }
  0xa2   :  { %1599 = vperm.xlu1 %1900, %v1561_v60  }
  0xa3   :  { %1654 = vperm.xlu0 %1899, %v1572_v7  }
  0xa4   :  { %873 = vmatmul.mubr.bf16.gmra.mrb[28].mxu1 %v338_v37 }
  0xa5   :  { %1006 = vmatmul.mubr.bf16.gmra.mrb[28].mxu0 %v340_v39  ;;  %882 = vmatprep.mubr.bf16.mxu1 %v345_v56 }
  0xa6   :  { %1781 = vmatprep.mubr.msk.bf16.mxu0 %vm606_vm0, %v347_v30  ;;  %1609 = vperm.xlu1 %1900, %v1563_v62  }
  0xaa   :  { %1619 = vperm.xlu1 %1900, %v1565_v6  }
  0xac   :  { %883 = vmatmul.mubr.bf16.gmra.mrb[32].mxu1 %v344_v59 }
  0xad   :  { %1016 = vmatmul.mubr.bf16.gmra.mrb[32].mxu0 %v346_v9  ;;  %892 = vmatprep.mubr.bf16.mxu1 %v351_v53 }
  0xae   :  { %1782 = vmatprep.mubr.msk.bf16.mxu0 %vm606_vm0, %v353_v12  ;;  %1629 = vperm.xlu1 %1900, %v1567_v18  }
  0xb2   :  { %1639 = vperm.xlu1 %1900, %v1569_v38  }
  0xb4   :  { %893 = vmatmul.mubr.bf16.gmra.mrb[36].mxu1 %v350_v33 }
  0xb5   :  { %1026 = vmatmul.mubr.bf16.gmra.mrb[36].mxu0 %v352_v20 }
  0xb6   :  { %1649 = vperm.xlu1 %1900, %v1571_v15  }
  0xd3   :  { %v3306_v36 = vpop.permute.xlu1 %1424 }
  0xdf   :  { %v3316_v20 = vpop.permute.xlu1 %1429 }
 0x117   :  { %v671_v17 = vpop.f32.mrb[0].mxu1 }
 0x118   :  { %v673_v49 = vpop.f32.mrb[1].mxu1 }
 0x119   :  { %v675_v63 = vpop.f32.mrb[2].mxu1 }
 0x11a   :  { %v677_v35 = vpop.f32.mrb[3].mxu1 }
 0x11f   :  { %v681_v54 = vpop.f32.mrb[4].mxu1 }
 0x120   :  { %v683_v21 = vpop.f32.mrb[5].mxu1 }
 0x121   :  { %v685_v22 = vpop.f32.mrb[6].mxu1 }
 0x122   :  { %v687_v42 = vpop.f32.mrb[7].mxu1 }
 0x127   :  { %v691_v43 = vpop.f32.mrb[8].mxu1 }
 0x128   :  { %v693_v4 = vpop.f32.mrb[9].mxu1 }
 0x129   :  { %v695_v5 = vpop.f32.mrb[10].mxu1 }
 0x12a   :  { %v697_v24 = vpop.f32.mrb[11].mxu1 }
 0x12f   :  { %v701_v28 = vpop.f32.mrb[12].mxu1 }
 0x130   :  { %v703_v41 = vpop.f32.mrb[13].mxu1 }
 0x131   :  { %v705_v29 = vpop.f32.mrb[14].mxu1 }
 0x132   :  { %v707_v13 = vpop.f32.mrb[15].mxu1 }
 0x137   :  { %v3260_v58 = vpop.f32.mrb[16].mxu1 }
 0x138   :  { %v3262_v32 = vpop.f32.mrb[17].mxu1 }
 0x139   :  { %v3264_v34 = vpop.f32.mrb[18].mxu1 }
 0x13a   :  { %v3266_v51 = vpop.f32.mrb[19].mxu1 }
 0x140   :  { %v937_v47 = vpop.f32.mrb[0].mxu0 }
 0x141   :  { %v3268_v19 = vadd.f32 %v937_v47, %v671_v17  ;;  %v939_v25 = vpop.f32.mrb[1].mxu0 }
 0x142   :  { %v3270_v60 = vadd.f32 %v939_v25, %v673_v49  ;;  %v941_v37 = vpop.f32.mrb[2].mxu0 }
 0x143   :  { %v3272_v7 = vadd.f32 %v941_v37, %v675_v63  ;;  %v943_v39 = vpop.f32.mrb[3].mxu0 }
 0x144   :  { %v3274_v56 = vadd.f32 %v943_v39, %v677_v35  ;;  %v1037_v40 = vsel %vm1036_vm1, %v3270_v60, 0.0 }
 0x145   :  { %v1038_v23 = vadd.f32 %v3268_v19, %v1037_v40 }
 0x146   :  { %v1041_v44 = vsel %vm1036_vm1, %v3274_v56, 0.0 }
 0x147   :  { %1039 = vadd.xlane.f32.xlu0 %v1038_v23  ;;  %v1042_v48 = vadd.f32 %v3272_v7, %v1041_v44 }
 0x148   :  { %v947_v30 = vpop.f32.mrb[4].mxu0 }
 0x149   :  { %v3281_v31 = vadd.f32 %v947_v30, %v681_v54  ;;  %v949_v45 = vpop.f32.mrb[5].mxu0 }
 0x14a   :  { %v3284_v50 = vadd.f32 %v949_v45, %v683_v21  ;;  %v951_v57 = vpop.f32.mrb[6].mxu0 }
 0x14b   :  { %v3286_v62 = vadd.f32 %v951_v57, %v685_v22  ;;  %v953_v52 = vpop.f32.mrb[7].mxu0  ;;  %1043 = vadd.xlane.f32.xlu0 %v1042_v48 }
 0x14c   :  { %v3288_v61 = vadd.f32 %v953_v52, %v687_v42  ;;  %v1045_v46 = vsel %vm1036_vm1, %v3284_v50, 0.0  ;;  %v3328_v42 = vpop.permute.xlu1 %1434 }
 0x14d   :  { %v1046_v0 = vadd.f32 %v3281_v31, %v1045_v46 }
 0x14e   :  { %v1049_v1 = vsel %vm1036_vm1, %v3288_v61, 0.0 }
 0x14f   :  { %1047 = vadd.xlane.f32.xlu1 %v1046_v0  ;;  %v1050_v6 = vadd.f32 %v3286_v62, %v1049_v1 }
 0x150   :  { %v957_v8 = vpop.f32.mrb[8].mxu0  ;;  %v3347_v25 = vpop.permute.xlu1 %1439 }
 0x151   :  { %v3295_v2 = vadd.f32 %v957_v8, %v691_v43  ;;  %v959_v3 = vpop.f32.mrb[9].mxu0 }
 0x152   :  { %v3298_v59 = vadd.f32 %v959_v3, %v693_v4  ;;  %v961_v9 = vpop.f32.mrb[10].mxu0 }
 0x153   :  { %v3300_v53 = vadd.f32 %v961_v9, %v695_v5  ;;  %v963_v27 = vpop.f32.mrb[11].mxu0  ;;  %1051 = vadd.xlane.f32.xlu1 %v1050_v6 }
 0x154   :  { %v3302_v55 = vadd.f32 %v963_v27, %v697_v24  ;;  %v1053_v12 = vsel %vm1036_vm1, %v3298_v59, 0.0  ;;  %v3363_v8 = vpop.permute.xlu1 %1444 }
 0x155   :  { %v1054_v10 = vadd.f32 %v3295_v2, %v1053_v12  ;;  %3904 = vst [vmem:[#allocation5_spill] sm:$0xff] %v3363_v8 }
 0x156   :  { %v1057_v18 = vsel %vm1036_vm1, %v3302_v55, 0.0 }
 0x157   :  { %1055 = vadd.xlane.f32.xlu0 %v1054_v10  ;;  %v1058_v11 = vadd.f32 %v3300_v53, %v1057_v18 }
 0x158   :  { %v967_v14 = vpop.f32.mrb[12].mxu0 }
 0x159   :  { %v3312_v26 = vadd.f32 %v967_v14, %v701_v28  ;;  %v969_v16 = vpop.f32.mrb[13].mxu0  ;;  %1059 = vadd.xlane.f32.xlu1 %v1058_v11 }
 0x15a   :  { %v3314_v38 = vadd.f32 %v969_v16, %v703_v41  ;;  %v971_v33 = vpop.f32.mrb[14].mxu0 }
 0x15b   :  { %v3318_v15 = vadd.f32 %v971_v33, %v705_v29  ;;  %v973_v17 = vpop.f32.mrb[15].mxu0 }
 0x15c   :  { %v3320_v49 = vadd.f32 %v973_v17, %v707_v13  ;;  %v1061_v63 = vsel %vm1036_vm1, %v3314_v38, 0.0 }
 0x15d   :  { %v1062_v35 = vadd.f32 %v3312_v26, %v1061_v63 }
 0x15e   :  { %v1065_v54 = vsel %vm1036_vm1, %v3320_v49, 0.0 }
 0x15f   :  { %1063 = vadd.xlane.f32.xlu0 %v1062_v35  ;;  %v1066_v21 = vadd.f32 %v3318_v15, %v1065_v54 }
 0x160   :  { %v977_v22 = vpop.f32.mrb[16].mxu0 }
 0x161   :  { %v3331_v43 = vadd.f32 %v977_v22, %v3260_v58  ;;  %v979_v4 = vpop.f32.mrb[17].mxu0  ;;  %1067 = vadd.xlane.f32.xlu1 %v1066_v21  ;;  %v3377_v21 = vpop.permute.xlu0 %1419 }
 0x162   :  { %v3334_v5 = vadd.f32 %v979_v4, %v3262_v32  ;;  %v981_v24 = vpop.f32.mrb[18].mxu0  ;;  %v3381_v4 = vpop.permute.xlu1 %1449 }
 0x163   :  { %v3337_v28 = vadd.f32 %v981_v24, %v3264_v34  ;;  %v983_v41 = vpop.f32.mrb[19].mxu0  ;;  %3905 = vst [vmem:[#allocation6_spill] sm:$0xff] %v3381_v4 }
 0x164   :  { %v3340_v29 = vadd.f32 %v983_v41, %v3266_v51  ;;  %v1069_v13 = vsel %vm1036_vm1, %v3334_v5, 0.0 }
 0x165   :  { %v1070_v47 = vadd.f32 %v3331_v43, %v1069_v13 }
 0x166   :  { %v1073_v58 = vsel %vm1036_vm1, %v3340_v29, 0.0 }
 0x167   :  { %1071 = vadd.xlane.f32.xlu0 %v1070_v47  ;;  %v854_v32 = vpop.f32.mrb[20].mxu1  ;;  %v1074_v37 = vadd.f32 %v3337_v28, %v1073_v58 }
 0x168   :  { %v987_v34 = vpop.f32.mrb[20].mxu0  ;;  %v856_v39 = vpop.f32.mrb[21].mxu1 }
 0x169   :  { %v3350_v40 = vadd.f32 %v987_v34, %v854_v32  ;;  %v989_v51 = vpop.f32.mrb[21].mxu0  ;;  %1075 = vadd.xlane.f32.xlu1 %v1074_v37  ;;  %v858_v23 = vpop.f32.mrb[22].mxu1 }
 0x16a   :  { %v3352_v44 = vadd.f32 %v989_v51, %v856_v39  ;;  %v991_v30 = vpop.f32.mrb[22].mxu0  ;;  %v860_v45 = vpop.f32.mrb[23].mxu1 }
 0x16b   :  { %v3354_v48 = vadd.f32 %v991_v30, %v858_v23  ;;  %v993_v57 = vpop.f32.mrb[23].mxu0 }
 0x16c   :  { %v3356_v52 = vadd.f32 %v993_v57, %v860_v45  ;;  %v1077_v46 = vsel %vm1036_vm1, %v3352_v44, 0.0 }
 0x16d   :  { %v1078_v0 = vadd.f32 %v3350_v40, %v1077_v46 }
 0x16e   :  { %v1081_v1 = vsel %vm1036_vm1, %v3356_v52, 0.0 }
 0x16f   :  { %1079 = vadd.xlane.f32.xlu0 %v1078_v0  ;;  %v864_v3 = vpop.f32.mrb[24].mxu1  ;;  %v1082_v6 = vadd.f32 %v3354_v48, %v1081_v1  ;;  %v3395_v0 = vpop.permute.xlu0 %1464 }
 0x170   :  { %v997_v9 = vpop.f32.mrb[24].mxu0  ;;  %v866_v27 = vpop.f32.mrb[25].mxu1  ;;  %3906 = vst [vmem:[#allocation7_spill] sm:$0xff] %v3395_v0 }
 0x171   :  { %v3366_v12 = vadd.f32 %v997_v9, %v864_v3  ;;  %v999_v10 = vpop.f32.mrb[25].mxu0  ;;  %1083 = vadd.xlane.f32.xlu1 %v1082_v6  ;;  %v868_v18 = vpop.f32.mrb[26].mxu1 }
 0x172   :  { %v3368_v11 = vadd.f32 %v999_v10, %v866_v27  ;;  %v1001_v14 = vpop.f32.mrb[26].mxu0  ;;  %v870_v16 = vpop.f32.mrb[27].mxu1 }
 0x173   :  { %v3370_v33 = vadd.f32 %v1001_v14, %v868_v18  ;;  %v1003_v17 = vpop.f32.mrb[27].mxu0  ;;  %v3399_v3 = vpop.permute.xlu1 %1454 }
 0x174   :  { %v3372_v63 = vadd.f32 %v1003_v17, %v870_v16  ;;  %v1085_v35 = vsel %vm1036_vm1, %v3368_v11, 0.0  ;;  %3907 = vst [vmem:[#allocation8_spill] sm:$0xff] %v3399_v3 }
 0x175   :  { %v1086_v54 = vadd.f32 %v3366_v12, %v1085_v35 }
 0x176   :  { %v1089_v22 = vsel %vm1036_vm1, %v3372_v63, 0.0 }
 0x177   :  { %1087 = vadd.xlane.f32.xlu0 %v1086_v54  ;;  %v874_v24 = vpop.f32.mrb[28].mxu1  ;;  %v1090_v41 = vadd.f32 %v3370_v33, %v1089_v22 }
 0x178   :  { %v1007_v13 = vpop.f32.mrb[28].mxu0  ;;  %v876_v47 = vpop.f32.mrb[29].mxu1 }
 0x179   :  { %v3384_v58 = vadd.f32 %v1007_v13, %v874_v24  ;;  %v1009_v32 = vpop.f32.mrb[29].mxu0  ;;  %1091 = vadd.xlane.f32.xlu1 %v1090_v41  ;;  %v878_v37 = vpop.f32.mrb[30].mxu1 }
 0x17a   :  { %v3386_v34 = vadd.f32 %v1009_v32, %v876_v47  ;;  %v1011_v39 = vpop.f32.mrb[30].mxu0  ;;  %v880_v51 = vpop.f32.mrb[31].mxu1 }
 0x17b   :  { %v3388_v23 = vadd.f32 %v1011_v39, %v878_v37  ;;  %v1013_v30 = vpop.f32.mrb[31].mxu0  ;;  %v3413_v32 = vpop.permute.xlu0 %1474 }
 0x17c   :  { %v3390_v45 = vadd.f32 %v1013_v30, %v880_v51  ;;  %v1093_v57 = vsel %vm1036_vm1, %v3386_v34, 0.0  ;;  %3908 = vst [vmem:[#allocation9_spill] sm:$0xff] %v3413_v32  ;;  %v3417_v39 = vpop.permute.xlu1 %1459 }
 0x17d   :  { %v1094_v46 = vadd.f32 %v3384_v58, %v1093_v57  ;;  %3909 = vst [vmem:[#allocation10_spill] sm:$0xff] %v3417_v39 }
 0x17e   :  { %v1097_v1 = vsel %vm1036_vm1, %v3390_v45, 0.0 }
 0x17f   :  { %1095 = vadd.xlane.f32.xlu0 %v1094_v46  ;;  %v884_v6 = vpop.f32.mrb[32].mxu1  ;;  %v1098_v9 = vadd.f32 %v3388_v23, %v1097_v1 }
 0x180   :  { %v1017_v27 = vpop.f32.mrb[32].mxu0  ;;  %v886_v10 = vpop.f32.mrb[33].mxu1 }
 0x181   :  { %v3402_v18 = vadd.f32 %v1017_v27, %v884_v6  ;;  %v1019_v14 = vpop.f32.mrb[33].mxu0  ;;  %1099 = vadd.xlane.f32.xlu1 %v1098_v9  ;;  %v888_v16 = vpop.f32.mrb[34].mxu1 }
 0x182   :  { %v3404_v17 = vadd.f32 %v1019_v14, %v886_v10  ;;  %v1021_v35 = vpop.f32.mrb[34].mxu0  ;;  %v890_v54 = vpop.f32.mrb[35].mxu1 }
 0x183   :  { %v3406_v22 = vadd.f32 %v1021_v35, %v888_v16  ;;  %v1023_v24 = vpop.f32.mrb[35].mxu0 }
 0x184   :  { %v3408_v41 = vadd.f32 %v1023_v24, %v890_v54  ;;  %v1101_v13 = vsel %vm1036_vm1, %v3404_v17, 0.0 }
 0x185   :  { %v1102_v47 = vadd.f32 %v3402_v18, %v1101_v13 }
 0x186   :  { %v1105_v37 = vsel %vm1036_vm1, %v3408_v41, 0.0 }
 0x187   :  { %1103 = vadd.xlane.f32.xlu0 %v1102_v47  ;;  %v894_v51 = vpop.f32.mrb[36].mxu1  ;;  %v1106_v30 = vadd.f32 %v3406_v22, %v1105_v37  ;;  %v3431_v47 = vpop.permute.xlu0 %1484 }
 0x188   :  { %v1027_v57 = vpop.f32.mrb[36].mxu0  ;;  %v896_v46 = vpop.f32.mrb[37].mxu1  ;;  %3910 = vst [vmem:[#allocation11_spill] sm:$0xff] %v3431_v47 }
 0x189   :  { %v3420_v1 = vadd.f32 %v1027_v57, %v894_v51  ;;  %v1029_v6 = vpop.f32.mrb[37].mxu0  ;;  %1107 = vadd.xlane.f32.xlu1 %v1106_v30  ;;  %v898_v9 = vpop.f32.mrb[38].mxu1 }
 0x18a   :  { %v3422_v27 = vadd.f32 %v1029_v6, %v896_v46  ;;  %v1031_v10 = vpop.f32.mrb[38].mxu0  ;;  %v900_v14 = vpop.f32.mrb[39].mxu1 }
 0x18b   :  { %v3424_v16 = vadd.f32 %v1031_v10, %v898_v9  ;;  %v1033_v35 = vpop.f32.mrb[39].mxu0  ;;  %v3436_v30 = vpop.permute.xlu1 %1469  ;;  %v1573_v10 = vld [vmem:[%s3872_s4 + $0x80] sm:$0xff] }
 0x18c   :  { %v3426_v54 = vadd.f32 %v1033_v35, %v900_v14  ;;  %v1109_v24 = vsel %vm1036_vm1, %v3422_v27, 0.0  ;;  %3911 = vst [vmem:[#allocation12_spill] sm:$0xff] %v3436_v30  ;;  %v3438_v57 = vpop.permute.xlu0 %1494 }
 0x18d   :  { %v1110_v13 = vadd.f32 %v3420_v1, %v1109_v24  ;;  %3912 = vst [vmem:[#allocation13_spill] sm:$0xff] %v3438_v57  ;;  %v1574_v24 = vld [vmem:[%s3872_s4 + $0x88] sm:$0xff] }
 0x18e   :  { %v1113_v37 = vsel %vm1036_vm1, %v3426_v54, 0.0 }
 0x18f   :  { %1111 = vadd.xlane.f32.xlu0 %v1110_v13  ;;  %v1114_v51 = vadd.f32 %v3424_v16, %v1113_v37  ;;  %v3440_v46 = vpop.permute.xlu1 %1479 }
 0x190   :  { %3913 = vst [vmem:[#allocation14_spill] sm:$0xff] %v3440_v46  ;;  %v3442_v6 = vpop.permute.xlu0 %1504 }
 0x191   :  { %1115 = vadd.xlane.f32.xlu1 %v1114_v51  ;;  %3914 = vst [vmem:[#allocation15_spill] sm:$0xff] %v3442_v6 }
 0x193   :  { %v3444_v9 = vpop.permute.xlu1 %1489 }
 0x194   :  { %3915 = vst [vmem:[#allocation16_spill] sm:$0xff] %v3444_v9  ;;  %v3449_v14 = vpop.permute.xlu0 %1514 }
 0x195   :  { %3916 = vst [vmem:[#allocation17_spill] sm:$0xff] %v3449_v14 }
 0x197   :  { %v3451_v35 = vpop.permute.xlu1 %1499 }
 0x198   :  { %3917 = vst [vmem:[#allocation18_spill] sm:$0xff] %v3451_v35  ;;  %v3456_v13 = vpop.permute.xlu0 %1584 }
 0x19b   :  { %v3458_v37 = vpop.permute.xlu1 %1509 }
 0x19c   :  { %3918 = vst [vmem:[#allocation19_spill] sm:$0xff] %v3458_v37  ;;  %v3460_v51 = vpop.permute.xlu0 %1594 }
 0x19f   :  { %v3462_v6 = vpop.permute.xlu1 %1579 }
 0x1a0   :  { %v3464_v57 = vpop.permute.xlu0 %1604 }
 0x1a1   :  { %3919 = vst [vmem:[#allocation20_spill] sm:$0xff] %v3464_v57 }
 0x1a2   :  { %1659 = vperm.xlu1 %1900, %v1573_v10  }
 0x1a3   :  { %v3466_v9 = vpop.permute.xlu1 %1589 }
 0x1a4   :  { %v3468_v14 = vpop.permute.xlu0 %1614 }
 0x1a5   :  { %1664 = vperm.xlu0 %1899, %v1574_v24   ;;  %3920 = vst [vmem:[#allocation21_spill] sm:$0xff] %v3468_v14 }
 0x1a7   :  { %v3470_v10 = vpop.permute.xlu1 %1599 }
 0x1a8   :  { %3921 = vst [vmem:[#allocation22_spill] sm:$0xff] %v3470_v10  ;;  %v3472_v35 = vpop.permute.xlu0 %1624 }
 0x1a9   :  { %3922 = vst [vmem:[#allocation23_spill] sm:$0xff] %v3472_v35 }
 0x1ab   :  { %v3474_v47 = vpop.permute.xlu1 %1609 }
 0x1ac   :  { %3923 = vst [vmem:[#allocation24_spill] sm:$0xff] %v3474_v47  ;;  %v3476_v24 = vpop.permute.xlu0 %1634 }
 0x1ad   :  { %3924 = vst [vmem:[#allocation25_spill] sm:$0xff] %v3476_v24 }
 0x1af   :  { %v3478_v46 = vpop.permute.xlu1 %1619 }
 0x1b0   :  { %3925 = vst [vmem:[#allocation26_spill] sm:$0xff] %v3478_v46  ;;  %v3480_v37 = vpop.permute.xlu0 %1644 }
 0x1b1   :  { %3926 = vst [vmem:[#allocation27_spill] sm:$0xff] %v3480_v37 }
 0x1b3   :  { %v3482_v32 = vpop.permute.xlu1 %1629 }
 0x1b4   :  { %3927 = vst [vmem:[#allocation28_spill] sm:$0xff] %v3482_v32  ;;  %v3484_v30 = vpop.permute.xlu0 %1654 }
 0x1b5   :  { %3928 = vst [vmem:[#allocation29_spill] sm:$0xff] %v3484_v30 }
 0x1b7   :  { %v3486_v0 = vpop.permute.xlu1 %1639 }
 0x1b8   :  { %3929 = vst [vmem:[#allocation30_spill] sm:$0xff] %v3486_v0 }
 0x1bb   :  { %v3494_v47 = vpop.permute.xlu1 %1649 }
 0x1bc   :  { %3930 = vst [vmem:[#allocation31_spill] sm:$0xff] %v3494_v47 }
 0x1d4   :  { %v1040_v39 = vpop.xlane.xlu0 %1039 }
 0x1d5   :  { %v1117_v14 = vmul.f32 0.0051020407, %v1040_v39 }
 0x1d7   :  { %v3489_v3 = vsub.f32 %v3268_v19, %v1117_v14  ;;  %v3492_v35 = vsub.f32 %v3270_v60, %v1117_v14 }
 0x1d8   :  { %v1044_v24 = vpop.xlane.xlu0 %1043 }
 0x1d9   :  { %v1118_v46 = vmul.f32 0.0051020407, %v1044_v24  ;;  %v1177_v37 = vmul.f32 %v3489_v3, %v3489_v3  ;;  %v1178_v30 = vmul.f32 %v3492_v35, %v3492_v35 }
 0x1db   :  { %v3501_v0 = vsub.f32 %v3272_v7, %v1118_v46  ;;  %v3504_v39 = vsub.f32 %v3274_v56, %v1118_v46  ;;  %v1217_v19 = vsel %vm1036_vm1, %v1178_v30, 0.0 }
 0x1dc   :  { %v1048_v60 = vpop.xlane.xlu1 %1047  ;;  %v1218_v14 = vadd.f32 %v1217_v19, %v1177_v37 }
 0x1dd   :  { %v1119_v32 = vmul.f32 0.0051020407, %v1048_v60  ;;  %v1179_v24 = vmul.f32 %v3501_v0, %v3501_v0  ;;  %v1180_v47 = vmul.f32 %v3504_v39, %v3504_v39 }
 0x1de   :  { %1219 = vadd.xlane.f32.xlu0 %v1218_v14 }
 0x1df   :  { %v3512_v4 = vsub.f32 %v3281_v31, %v1119_v32  ;;  %v3515_v7 = vsub.f32 %v3284_v50, %v1119_v32  ;;  %v1221_v56 = vsel %vm1036_vm1, %v1180_v47, 0.0 }
 0x1e0   :  { %v1052_v46 = vpop.xlane.xlu1 %1051  ;;  %v1222_v30 = vadd.f32 %v1221_v56, %v1179_v24 }
 0x1e1   :  { %v1120_v57 = vmul.f32 0.0051020407, %v1052_v46  ;;  %v1181_v37 = vmul.f32 %v3512_v4, %v3512_v4  ;;  %v1182_v19 = vmul.f32 %v3515_v7, %v3515_v7 }
 0x1e2   :  { %1223 = vadd.xlane.f32.xlu1 %v1222_v30 }
 0x1e3   :  { %v3523_v60 = vsub.f32 %v3286_v62, %v1120_v57  ;;  %v3526_v31 = vsub.f32 %v3288_v61, %v1120_v57  ;;  %v1225_v50 = vsel %vm1036_vm1, %v1182_v19, 0.0 }
 0x1e4   :  { %v1056_v32 = vpop.xlane.xlu0 %1055  ;;  %v1226_v47 = vadd.f32 %v1225_v50, %v1181_v37 }
 0x1e5   :  { %v1121_v14 = vmul.f32 0.0051020407, %v1056_v32  ;;  %v1183_v24 = vmul.f32 %v3523_v60, %v3523_v60  ;;  %v1184_v56 = vmul.f32 %v3526_v31, %v3526_v31 }
 0x1e6   :  { %v1060_v46 = vpop.xlane.xlu1 %1059  ;;  %1227 = vadd.xlane.f32.xlu0 %v1226_v47 }
 0x1e7   :  { %v3534_v30 = vsub.f32 %v3295_v2, %v1121_v14  ;;  %v3537_v62 = vsub.f32 %v3298_v59, %v1121_v14  ;;  %v1122_v61 = vmul.f32 0.0051020407, %v1060_v46  ;;  %v1229_v57 = vsel %vm1036_vm1, %v1184_v56, 0.0 }
 0x1e8   :  { %v1230_v19 = vadd.f32 %v1229_v57, %v1183_v24 }
 0x1e9   :  { %v3541_v37 = vsub.f32 %v3300_v53, %v1122_v61  ;;  %v3544_v50 = vsub.f32 %v3302_v55, %v1122_v61  ;;  %v1185_v32 = vmul.f32 %v3534_v30, %v3534_v30  ;;  %v1186_v2 = vmul.f32 %v3537_v62, %v3537_v62 }
 0x1ea   :  { %1231 = vadd.xlane.f32.xlu1 %v1230_v19 }
 0x1eb   :  { %v1233_v59 = vsel %vm1036_vm1, %v1186_v2, 0.0  ;;  %v1187_v47 = vmul.f32 %v3541_v37, %v3541_v37  ;;  %v1188_v14 = vmul.f32 %v3544_v50, %v3544_v50 }
 0x1ec   :  { %v1064_v53 = vpop.xlane.xlu0 %1063  ;;  %v1234_v24 = vadd.f32 %v1233_v59, %v1185_v32 }
 0x1ed   :  { %v1123_v56 = vmul.f32 0.0051020407, %v1064_v53  ;;  %v1237_v55 = vsel %vm1036_vm1, %v1188_v14, 0.0 }
 0x1ee   :  { %v1068_v46 = vpop.xlane.xlu1 %1067  ;;  %1235 = vadd.xlane.f32.xlu0 %v1234_v24  ;;  %v1238_v61 = vadd.f32 %v1237_v55, %v1187_v47 }
 0x1ef   :  { %v3557_v57 = vsub.f32 %v3312_v26, %v1123_v56  ;;  %v3560_v19 = vsub.f32 %v3314_v38, %v1123_v56  ;;  %v1124_v2 = vmul.f32 0.0051020407, %v1068_v46 }
 0x1f0   :  { %1239 = vadd.xlane.f32.xlu1 %v1238_v61 }
 0x1f1   :  { %v3563_v8 = vsub.f32 %v3318_v15, %v1124_v2  ;;  %v3566_v10 = vsub.f32 %v3320_v49, %v1124_v2  ;;  %v1189_v32 = vmul.f32 %v3557_v57, %v3557_v57  ;;  %v1190_v59 = vmul.f32 %v3560_v19, %v3560_v19 }
 0x1f3   :  { %v1241_v26 = vsel %vm1036_vm1, %v1190_v59, 0.0  ;;  %v1191_v38 = vmul.f32 %v3563_v8, %v3563_v8  ;;  %v1192_v47 = vmul.f32 %v3566_v10, %v3566_v10 }
 0x1f4   :  { %v1072_v14 = vpop.xlane.xlu0 %1071  ;;  %v1242_v15 = vadd.f32 %v1241_v26, %v1189_v32 }
 0x1f5   :  { %v1125_v53 = vmul.f32 0.0051020407, %v1072_v14  ;;  %v1245_v49 = vsel %vm1036_vm1, %v1192_v47, 0.0 }
 0x1f6   :  { %v1076_v24 = vpop.xlane.xlu1 %1075  ;;  %1243 = vadd.xlane.f32.xlu0 %v1242_v15  ;;  %v1246_v56 = vadd.f32 %v1245_v49, %v1191_v38 }
 0x1f7   :  { %v3579_v55 = vsub.f32 %v3331_v43, %v1125_v53  ;;  %v3582_v46 = vsub.f32 %v3334_v5, %v1125_v53  ;;  %v1126_v61 = vmul.f32 0.0051020407, %v1076_v24 }
 0x1f8   :  { %1247 = vadd.xlane.f32.xlu1 %v1246_v56 }
 0x1f9   :  { %v3585_v2 = vsub.f32 %v3337_v28, %v1126_v61  ;;  %v3588_v59 = vsub.f32 %v3340_v29, %v1126_v61  ;;  %v1193_v32 = vmul.f32 %v3579_v55, %v3579_v55  ;;  %v1194_v26 = vmul.f32 %v3582_v46, %v3582_v46 }
 0x1fb   :  { %v1249_v43 = vsel %vm1036_vm1, %v1194_v26, 0.0  ;;  %v1195_v5 = vmul.f32 %v3585_v2, %v3585_v2  ;;  %v1196_v38 = vmul.f32 %v3588_v59, %v3588_v59 }
 0x1fc   :  { %v1080_v47 = vpop.xlane.xlu0 %1079  ;;  %v1250_v28 = vadd.f32 %v1249_v43, %v1193_v32 }
 0x1fd   :  { %v1127_v14 = vmul.f32 0.0051020407, %v1080_v47  ;;  %v1253_v29 = vsel %vm1036_vm1, %v1196_v38, 0.0 }
 0x1fe   :  { %v1084_v15 = vpop.xlane.xlu1 %1083  ;;  %1251 = vadd.xlane.f32.xlu0 %v1250_v28  ;;  %v1254_v53 = vadd.f32 %v1253_v29, %v1195_v5 }
 0x1ff   :  { %v3601_v49 = vsub.f32 %v3350_v40, %v1127_v14  ;;  %v3604_v24 = vsub.f32 %v3352_v44, %v1127_v14  ;;  %v1128_v56 = vmul.f32 0.0051020407, %v1084_v15 }
 0x200   :  { %1255 = vadd.xlane.f32.xlu1 %v1254_v53 }
 0x201   :  { %v3607_v61 = vsub.f32 %v3354_v48, %v1128_v56  ;;  %v3610_v26 = vsub.f32 %v3356_v52, %v1128_v56  ;;  %v1197_v32 = vmul.f32 %v3601_v49, %v3601_v49  ;;  %v1198_v43 = vmul.f32 %v3604_v24, %v3604_v24 }
 0x203   :  { %v1257_v40 = vsel %vm1036_vm1, %v1198_v43, 0.0  ;;  %v1199_v44 = vmul.f32 %v3607_v61, %v3607_v61  ;;  %v1200_v5 = vmul.f32 %v3610_v26, %v3610_v26 }
 0x204   :  { %v1088_v38 = vpop.xlane.xlu0 %1087  ;;  %v1258_v48 = vadd.f32 %v1257_v40, %v1197_v32 }
 0x205   :  { %v1129_v47 = vmul.f32 0.0051020407, %v1088_v38  ;;  %v1261_v52 = vsel %vm1036_vm1, %v1200_v5, 0.0 }
 0x206   :  { %v1092_v28 = vpop.xlane.xlu1 %1091  ;;  %1259 = vadd.xlane.f32.xlu0 %v1258_v48  ;;  %v1262_v14 = vadd.f32 %v1261_v52, %v1199_v44 }
 0x207   :  { %v3623_v29 = vsub.f32 %v3366_v12, %v1129_v47  ;;  %v3626_v15 = vsub.f32 %v3368_v11, %v1129_v47  ;;  %v1130_v53 = vmul.f32 0.0051020407, %v1092_v28 }
 0x208   :  { %1263 = vadd.xlane.f32.xlu1 %v1262_v14 }
 0x209   :  { %v3629_v56 = vsub.f32 %v3370_v33, %v1130_v53  ;;  %v3632_v43 = vsub.f32 %v3372_v63, %v1130_v53  ;;  %v1201_v32 = vmul.f32 %v3623_v29, %v3623_v29  ;;  %v1202_v40 = vmul.f32 %v3626_v15, %v3626_v15 }
 0x20b   :  { %v1265_v12 = vsel %vm1036_vm1, %v1202_v40, 0.0  ;;  %v1203_v11 = vmul.f32 %v3629_v56, %v3629_v56  ;;  %v1204_v44 = vmul.f32 %v3632_v43, %v3632_v43 }
 0x20c   :  { %v1096_v5 = vpop.xlane.xlu0 %1095  ;;  %v1266_v33 = vadd.f32 %v1265_v12, %v1201_v32 }
 0x20d   :  { %v1131_v38 = vmul.f32 0.0051020407, %v1096_v5  ;;  %v1269_v63 = vsel %vm1036_vm1, %v1204_v44, 0.0 }
 0x20e   :  { %v1100_v48 = vpop.xlane.xlu1 %1099  ;;  %1267 = vadd.xlane.f32.xlu0 %v1266_v33  ;;  %v1270_v47 = vadd.f32 %v1269_v63, %v1203_v11 }
 0x20f   :  { %v3645_v52 = vsub.f32 %v3384_v58, %v1131_v38  ;;  %v3648_v28 = vsub.f32 %v3386_v34, %v1131_v38  ;;  %v1132_v14 = vmul.f32 0.0051020407, %v1100_v48 }
 0x210   :  { %1271 = vadd.xlane.f32.xlu1 %v1270_v47 }
 0x211   :  { %v3651_v53 = vsub.f32 %v3388_v23, %v1132_v14  ;;  %v3654_v40 = vsub.f32 %v3390_v45, %v1132_v14  ;;  %v1205_v32 = vmul.f32 %v3645_v52, %v3645_v52  ;;  %v1206_v12 = vmul.f32 %v3648_v28, %v3648_v28 }
 0x213   :  { %v1273_v58 = vsel %vm1036_vm1, %v1206_v12, 0.0  ;;  %v1207_v34 = vmul.f32 %v3651_v53, %v3651_v53  ;;  %v1208_v11 = vmul.f32 %v3654_v40, %v3654_v40 }
 0x214   :  { %v1104_v44 = vpop.xlane.xlu0 %1103  ;;  %v1274_v23 = vadd.f32 %v1273_v58, %v1205_v32 }
 0x215   :  { %v1133_v5 = vmul.f32 0.0051020407, %v1104_v44  ;;  %v1277_v45 = vsel %vm1036_vm1, %v1208_v11, 0.0 }
 0x216   :  { %v1108_v33 = vpop.xlane.xlu1 %1107  ;;  %1275 = vadd.xlane.f32.xlu0 %v1274_v23  ;;  %v1278_v38 = vadd.f32 %v1277_v45, %v1207_v34 }
 0x217   :  { %v3667_v63 = vsub.f32 %v3402_v18, %v1133_v5  ;;  %v3670_v48 = vsub.f32 %v3404_v17, %v1133_v5  ;;  %v1134_v47 = vmul.f32 0.0051020407, %v1108_v33 }
 0x218   :  { %1279 = vadd.xlane.f32.xlu1 %v1278_v38 }
 0x219   :  { %v3673_v14 = vsub.f32 %v3406_v22, %v1134_v47  ;;  %v3676_v12 = vsub.f32 %v3408_v41, %v1134_v47  ;;  %v1209_v32 = vmul.f32 %v3667_v63, %v3667_v63  ;;  %v1210_v58 = vmul.f32 %v3670_v48, %v3670_v48 }
 0x21b   :  { %v1281_v18 = vsel %vm1036_vm1, %v1210_v58, 0.0  ;;  %v1211_v17 = vmul.f32 %v3673_v14, %v3673_v14  ;;  %v1212_v34 = vmul.f32 %v3676_v12, %v3676_v12 }
 0x21c   :  { %v1112_v11 = vpop.xlane.xlu0 %1111  ;;  %v1282_v22 = vadd.f32 %v1281_v18, %v1209_v32 }
 0x21d   :  { %v1135_v44 = vmul.f32 0.0051020407, %v1112_v11  ;;  %v1285_v41 = vsel %vm1036_vm1, %v1212_v34, 0.0  ;;  %v1575_v11 = vld [vmem:[%s3872_s4 + $0x90] sm:$0xff] }
 0x21e   :  { %1283 = vadd.xlane.f32.xlu0 %v1282_v22  ;;  %v1116_v23 = vpop.xlane.xlu1 %1115  ;;  %v1286_v5 = vadd.f32 %v1285_v41, %v1211_v17  ;;  %v1576_v22 = vld [vmem:[%s3872_s4 + $0x98] sm:$0xff]  ;;  %s1966_s4 = smov [#allocation2]  }
 0x21f   :  { %v3689_v45 = vsub.f32 %v3420_v1, %v1135_v44  ;;  %v3692_v33 = vsub.f32 %v3422_v27, %v1135_v44  ;;  %v1136_v38 = vmul.f32 0.0051020407, %v1116_v23  ;;  %s1762_s22 = sshll.u32 %s1966_s4, 4  ;;  %s1763_s22 = int_to_ptr.vmem [resolvable:$true] %s1762_s22 }
 0x220   :  { %1287 = vadd.xlane.f32.xlu1 %v1286_v5  ;;  %s1941_s23 = scalar_lea.vmem %s1763_s22, 5120  ;;  %p1946_p1 = scmp.lt.s32.totalorder %s1763_s22, %s1763_s22 }
 0x221   :  { %3931 = vst [vmem:[#allocation32_spill] sm:$0xff] %v3692_v33  ;;  %v3695_v47 = vsub.f32 %v3424_v16, %v1136_v38  ;;  %v3698_v58 = vsub.f32 %v3426_v54, %v1136_v38  ;;  %v1213_v32 = vmul.f32 %v3689_v45, %v3689_v45  ;;  %v1214_v18 = vmul.f32 %v3692_v33, %v3692_v33  ;;  %p1942_p0 = scmp.ne.s32.totalorder %s1763_s22, %s1941_s23  ;;  %p1947_p2 = scmp.lt.s32.totalorder %s1941_s23, %s1941_s23 }
 0x222   :  { %v3718_v41 = vpop.permute.xlu1 %1659 }
 0x223   :  { %3932 = vst [vmem:[#allocation33_spill] sm:$0xff] %v3695_v47  ;;  %3933 = vst [vmem:[#allocation34_spill] sm:$0xff] %v3698_v58  ;;  %v1289_v1 = vsel %vm1036_vm1, %v1214_v18, 0.0  ;;  %v1215_v27 = vmul.f32 %v3695_v47, %v3695_v47  ;;  %v1216_v17 = vmul.f32 %v3698_v58, %v3698_v58  ;;  %p1948_p3 = por %p1947_p2, %p1946_p1 }
 0x224   :  { %v1290_v34 = vadd.f32 %v1289_v1, %v1213_v32  ;;  %v3716_v44 = vpop.permute.xlu0 %1664 }
 0x225   :  { %v1293_v16 = vsel %vm1036_vm1, %v1216_v17, 0.0  ;;  %p1949_p4 = pnand %p1948_p3, %p1942_p0 }
 0x226   :  { %1291 = vadd.xlane.f32.xlu0 %v1290_v34  ;;  %v1294_v54 = vadd.f32 %v1293_v16, %v1215_v27 }
 0x228   :  { %1295 = vadd.xlane.f32.xlu1 %v1294_v54 }
 0x239   :  { %1669 = vperm.xlu1 %1900, %v1575_v11  }
 0x23c   :  { %1674 = vperm.xlu0 %1899, %v1576_v22  }
 0x26b   :  { %v1220_v23 = vpop.xlane.xlu0 %1219 }
 0x26c   :  { %v1297_v5 = vmul.f32 0.0051020407, %v1220_v23 }
 0x26e   :  { %v1317_v38 = vadd.f32 1e-05, %v1297_v5 }
 0x26f   :  { %v1224_v32 = vpop.xlane.xlu1 %1223 }
 0x270   :  { %1901 = vrsqrt.f32 %v1317_v38  ;;  %v1298_v18 = vmul.f32 0.0051020407, %v1224_v32 }
 0x272   :  { %v1318_v1 = vadd.f32 1e-05, %v1298_v18 }
 0x273   :  { %v1228_v27 = vpop.xlane.xlu0 %1227 }
 0x274   :  { %1903 = vrsqrt.f32 %v1318_v1  ;;  %v1299_v17 = vmul.f32 0.0051020407, %v1228_v27 }
 0x276   :  { %v1319_v34 = vadd.f32 1e-05, %v1299_v17 }
 0x277   :  { %v1232_v16 = vpop.xlane.xlu1 %1231 }
 0x278   :  { %1905 = vrsqrt.f32 %v1319_v34  ;;  %v1300_v54 = vmul.f32 0.0051020407, %v1232_v16 }
 0x27a   :  { %v1902_v11 = vpop.eup %1901  ;;  %v1320_v22 = vadd.f32 1e-05, %v1300_v54 }
 0x27b   :  { %v1357_v58 = vmul.f32 %v1902_v11, %v3489_v3  ;;  %v1358_v47 = vmul.f32 %v1902_v11, %v3492_v35  ;;  %v1236_v33 = vpop.xlane.xlu0 %1235 }
 0x27c   :  { %1907 = vrsqrt.f32 %v1320_v22  ;;  %v1301_v23 = vmul.f32 0.0051020407, %v1236_v33 }
 0x27d   :  { %v1517_v5 = vmul.f32 %v3377_v21, %v1357_v58  ;;  %v1518_v38 = vmul.f32 %v3377_v21, %v1358_v47  ;;  %v1240_v32 = vpop.xlane.xlu1 %1239 }
 0x27e   :  { %v1904_v18 = vpop.eup %1903  ;;  %v1321_v1 = vadd.f32 1e-05, %v1301_v23  ;;  %v1302_v27 = vmul.f32 0.0051020407, %v1240_v32 }
 0x27f   :  { %v1677_v17 = vadd.f32 %v3462_v6, %v1517_v5  ;;  %v1678_v34 = vadd.f32 %v3462_v6, %v1518_v38  ;;  %v1359_v16 = vmul.f32 %v1904_v18, %v3501_v0  ;;  %v1360_v3 = vmul.f32 %v1904_v18, %v3504_v39 }
 0x280   :  { %1909 = vrsqrt.f32 %v1321_v1  ;;  %v1322_v35 = vadd.f32 1e-05, %v1302_v27 }
 0x281   :  { %1717 = vst [vmem:[#allocation2] sm:$0xff] %v1677_v17  ;;  %1718 = vst.msk [vmem:[#allocation2 + $0x8] sm:$0xff] %vm1036_vm1, %v1678_v34  ;;  %v1519_v33 = vmul.f32 %v3306_v36, %v1359_v16  ;;  %v1520_v21 = vmul.f32 %v3306_v36, %v1360_v3 }
 0x282   :  { %v1906_v47 = vpop.eup %1905  ;;  %1911 = vrsqrt.f32 %v1322_v35 }
 0x283   :  { %v1679_v58 = vadd.f32 %v3456_v13, %v1519_v33  ;;  %v1680_v54 = vadd.f32 %v3456_v13, %v1520_v21  ;;  %v1361_v6 = vmul.f32 %v1906_v47, %v3512_v4  ;;  %v1362_v0 = vmul.f32 %v1906_v47, %v3515_v7  ;;  %v1244_v39 = vpop.xlane.xlu0 %1243 }
 0x284   :  { %v1303_v11 = vmul.f32 0.0051020407, %v1244_v39 }
 0x285   :  { %1719 = vst [vmem:[#allocation2 + $0x10] sm:$0xff] %v1679_v58  ;;  %1720 = vst.msk [vmem:[#allocation2 + $0x18] sm:$0xff] %vm1036_vm1, %v1680_v54  ;;  %v1521_v22 = vmul.f32 %v3316_v20, %v1361_v6  ;;  %v1522_v23 = vmul.f32 %v3316_v20, %v1362_v0  ;;  %v1248_v36 = vpop.xlane.xlu1 %1247  ;;  %v3935_v0 = vld [vmem:[#allocation5_spill] sm:$0xff] }
 0x286   :  { %v1908_v5 = vpop.eup %1907  ;;  %v1323_v38 = vadd.f32 1e-05, %v1303_v11  ;;  %v1304_v32 = vmul.f32 0.0051020407, %v1248_v36 }
 0x287   :  { %v1681_v18 = vadd.f32 %v3466_v9, %v1521_v22  ;;  %v1682_v13 = vadd.f32 %v3466_v9, %v1522_v23  ;;  %v1363_v4 = vmul.f32 %v1908_v5, %v3523_v60  ;;  %v1364_v7 = vmul.f32 %v1908_v5, %v3526_v31 }
 0x288   :  { %1913 = vrsqrt.f32 %v1323_v38  ;;  %v1324_v1 = vadd.f32 1e-05, %v1304_v32 }
 0x289   :  { %1721 = vst [vmem:[#allocation2 + $0x20] sm:$0xff] %v1681_v18  ;;  %1722 = vst.msk [vmem:[#allocation2 + $0x28] sm:$0xff] %vm1036_vm1, %v1682_v13  ;;  %v1523_v27 = vmul.f32 %v3328_v42, %v1363_v4  ;;  %v1524_v20 = vmul.f32 %v3328_v42, %v1364_v7  ;;  %v3937_v13 = vld [vmem:[#allocation6_spill] sm:$0xff] }
 0x28a   :  { %v1910_v17 = vpop.eup %1909  ;;  %1915 = vrsqrt.f32 %v1324_v1 }
 0x28b   :  { %v1683_v34 = vadd.f32 %v3460_v51, %v1523_v27  ;;  %v1684_v16 = vadd.f32 %v3460_v51, %v1524_v20  ;;  %v1365_v9 = vmul.f32 %v1910_v17, %v3534_v30  ;;  %v1366_v60 = vmul.f32 %v1910_v17, %v3537_v62  ;;  %v1252_v31 = vpop.xlane.xlu0 %1251  ;;  %v3934_v30 = vld [vmem:[#allocation22_spill] sm:$0xff] }
 0x28c   :  { %v1912_v3 = vpop.eup %1911  ;;  %v1305_v35 = vmul.f32 0.0051020407, %v1252_v31 }
 0x28d   :  { %1723 = vst [vmem:[#allocation2 + $0x30] sm:$0xff] %v1683_v34  ;;  %1724 = vst.msk [vmem:[#allocation2 + $0x38] sm:$0xff] %vm1036_vm1, %v1684_v16  ;;  %v1525_v33 = vmul.f32 %v3347_v25, %v1365_v9  ;;  %v1526_v42 = vmul.f32 %v3347_v25, %v1366_v60  ;;  %v1367_v21 = vmul.f32 %v1912_v3, %v3541_v37  ;;  %v1256_v58 = vpop.xlane.xlu1 %1255  ;;  %v3936_v25 = vld [vmem:[#allocation20_spill] sm:$0xff] }
 0x28e   :  { %v1368_v47 = vmul.f32 %v1912_v3, %v3544_v50  ;;  %v1325_v51 = vadd.f32 1e-05, %v1305_v35  ;;  %v1306_v54 = vmul.f32 0.0051020407, %v1256_v58  ;;  %v3938_v16 = vld [vmem:[#allocation24_spill] sm:$0xff]  ;;  %v3940_v35 = vld [vmem:[#allocation21_spill] sm:$0xff] }
 0x28f   :  { %v1685_v6 = vadd.f32 %v3934_v30, %v1525_v33  ;;  %v1686_v62 = vadd.f32 %v3934_v30, %v1526_v42  ;;  %v1527_v39 = vmul.f32 %v3935_v0, %v1367_v21  ;;  %v3939_v60 = vld [vmem:[#allocation8_spill] sm:$0xff] }
 0x290   :  { %v1528_v11 = vmul.f32 %v3935_v0, %v1368_v47  ;;  %1917 = vrsqrt.f32 %v1325_v51  ;;  %v1326_v22 = vadd.f32 1e-05, %v1306_v54  ;;  %v3941_v54 = vld [vmem:[#allocation10_spill] sm:$0xff] }
 0x291   :  { %1725 = vst [vmem:[#allocation2 + $0x40] sm:$0xff] %v1685_v6  ;;  %1726 = vst.msk [vmem:[#allocation2 + $0x48] sm:$0xff] %vm1036_vm1, %v1686_v62  ;;  %v1687_v37 = vadd.f32 %v3936_v25, %v1527_v39 }
 0x292   :  { %v1688_v50 = vadd.f32 %v3936_v25, %v1528_v11  ;;  %v1914_v23 = vpop.eup %1913  ;;  %1919 = vrsqrt.f32 %v1326_v22  ;;  %v3942_v25 = vld [vmem:[#allocation26_spill] sm:$0xff] }
 0x293   :  { %1727 = vst [vmem:[#allocation2 + $0x50] sm:$0xff] %v1687_v37  ;;  %v1369_v36 = vmul.f32 %v1914_v23, %v3557_v57  ;;  %v1370_v5 = vmul.f32 %v1914_v23, %v3560_v19  ;;  %v1260_v38 = vpop.xlane.xlu0 %1259 }
 0x294   :  { %1728 = vst.msk [vmem:[#allocation2 + $0x58] sm:$0xff] %vm1036_vm1, %v1688_v50  ;;  %v1916_v32 = vpop.eup %1915  ;;  %v1307_v18 = vmul.f32 0.0051020407, %v1260_v38  ;;  %v3943_v50 = vld [vmem:[#allocation7_spill] sm:$0xff] }
 0x295   :  { %v1529_v4 = vmul.f32 %v3937_v13, %v1369_v36  ;;  %v1530_v7 = vmul.f32 %v3937_v13, %v1370_v5  ;;  %v1371_v1 = vmul.f32 %v1916_v32, %v3563_v8  ;;  %v1372_v27 = vmul.f32 %v1916_v32, %v3566_v10  ;;  %v1264_v20 = vpop.xlane.xlu1 %1263  ;;  %v3944_v5 = vld [vmem:[#allocation23_spill] sm:$0xff] }
 0x296   :  { %v1327_v17 = vadd.f32 1e-05, %v1307_v18  ;;  %v1308_v34 = vmul.f32 0.0051020407, %v1264_v20 }
 0x297   :  { %v1689_v9 = vadd.f32 %v3938_v16, %v1529_v4  ;;  %v1690_v57 = vadd.f32 %v3938_v16, %v1530_v7  ;;  %v1531_v19 = vmul.f32 %v3939_v60, %v1371_v1  ;;  %v1532_v31 = vmul.f32 %v3939_v60, %v1372_v27  ;;  %v3945_v1 = vld [vmem:[#allocation12_spill] sm:$0xff] }
 0x298   :  { %1921 = vrsqrt.f32 %v1327_v17  ;;  %v1328_v3 = vadd.f32 1e-05, %v1308_v34  ;;  %v3946_v60 = vld [vmem:[#allocation28_spill] sm:$0xff] }
 0x299   :  { %1729 = vst [vmem:[#allocation2 + $0x60] sm:$0xff] %v1689_v9  ;;  %1730 = vst.msk [vmem:[#allocation2 + $0x68] sm:$0xff] %vm1036_vm1, %v1690_v57  ;;  %v1691_v8 = vadd.f32 %v3940_v35, %v1531_v19  ;;  %v1692_v10 = vadd.f32 %v3940_v35, %v1532_v31  ;;  %v3947_v31 = vld [vmem:[#allocation9_spill] sm:$0xff] }
 0x29a   :  { %v1918_v33 = vpop.eup %1917  ;;  %1923 = vrsqrt.f32 %v1328_v3 }
 0x29b   :  { %1731 = vst [vmem:[#allocation2 + $0x70] sm:$0xff] %v1691_v8  ;;  %1732 = vst.msk [vmem:[#allocation2 + $0x78] sm:$0xff] %vm1036_vm1, %v1692_v10  ;;  %v1373_v42 = vmul.f32 %v1918_v33, %v3579_v55  ;;  %v1374_v21 = vmul.f32 %v1918_v33, %v3582_v46  ;;  %v1268_v47 = vpop.xlane.xlu0 %1267  ;;  %v3948_v8 = vld [vmem:[#allocation25_spill] sm:$0xff] }
 0x29c   :  { %v1920_v58 = vpop.eup %1919  ;;  %v1309_v51 = vmul.f32 0.0051020407, %v1268_v47 }
 0x29d   :  { %v1533_v30 = vmul.f32 %v3941_v54, %v1373_v42  ;;  %v1534_v6 = vmul.f32 %v3941_v54, %v1374_v21  ;;  %v1375_v62 = vmul.f32 %v1920_v58, %v3585_v2  ;;  %v1376_v0 = vmul.f32 %v1920_v58, %v3588_v59  ;;  %v1272_v39 = vpop.xlane.xlu1 %1271 }
 0x29e   :  { %v1329_v11 = vadd.f32 1e-05, %v1309_v51  ;;  %v1310_v22 = vmul.f32 0.0051020407, %v1272_v39  ;;  %v3949_v51 = vld [vmem:[#allocation14_spill] sm:$0xff] }
 0x29f   :  { %v1693_v37 = vadd.f32 %v3942_v25, %v1533_v30  ;;  %v1694_v55 = vadd.f32 %v3942_v25, %v1534_v6  ;;  %v1535_v46 = vmul.f32 %v3943_v50, %v1375_v62  ;;  %v1536_v23 = vmul.f32 %v3943_v50, %v1376_v0 }
 0x2a0   :  { %1925 = vrsqrt.f32 %v1329_v11  ;;  %v1330_v36 = vadd.f32 1e-05, %v1310_v22  ;;  %v3950_v22 = vld [vmem:[#allocation30_spill] sm:$0xff] }
 0x2a1   :  { %1733 = vst [vmem:[#allocation2 + $0x80] sm:$0xff] %v1693_v37  ;;  %1734 = vst.msk [vmem:[#allocation2 + $0x88] sm:$0xff] %vm1036_vm1, %v1694_v55  ;;  %v1695_v2 = vadd.f32 %v3944_v5, %v1535_v46  ;;  %v1696_v59 = vadd.f32 %v3944_v5, %v1536_v23  ;;  %v3951_v37 = vld [vmem:[#allocation11_spill] sm:$0xff] }
 0x2a2   :  { %v1922_v38 = vpop.eup %1921  ;;  %1927 = vrsqrt.f32 %v1330_v36  ;;  %v3952_v46 = vld [vmem:[#allocation27_spill] sm:$0xff] }
 0x2a3   :  { %1735 = vst [vmem:[#allocation2 + $0x90] sm:$0xff] %v1695_v2  ;;  %1736 = vst.msk [vmem:[#allocation2 + $0x98] sm:$0xff] %vm1036_vm1, %v1696_v59  ;;  %v1377_v32 = vmul.f32 %v1922_v38, %v3601_v49  ;;  %v1378_v18 = vmul.f32 %v1922_v38, %v3604_v24  ;;  %v1276_v13 = vpop.xlane.xlu0 %1275 }
 0x2a4   :  { %v1924_v4 = vpop.eup %1923  ;;  %v1311_v7 = vmul.f32 0.0051020407, %v1276_v13 }
 0x2a5   :  { %v1537_v27 = vmul.f32 %v3945_v1, %v1377_v32  ;;  %v1538_v20 = vmul.f32 %v3945_v1, %v1378_v18  ;;  %v1379_v17 = vmul.f32 %v1924_v4, %v3607_v61  ;;  %v1380_v34 = vmul.f32 %v1924_v4, %v3610_v26  ;;  %v1280_v16 = vpop.xlane.xlu1 %1279  ;;  %v3953_v32 = vld [vmem:[#allocation16_spill] sm:$0xff] }
 0x2a6   :  { %v1331_v9 = vadd.f32 1e-05, %v1311_v7  ;;  %v1312_v57 = vmul.f32 0.0051020407, %v1280_v16  ;;  %v3955_v16 = vld [vmem:[#allocation13_spill] sm:$0xff] }
 0x2a7   :  { %v1697_v19 = vadd.f32 %v3946_v60, %v1537_v27  ;;  %v1698_v49 = vadd.f32 %v3946_v60, %v1538_v20  ;;  %v1539_v24 = vmul.f32 %v3947_v31, %v1379_v17  ;;  %v1540_v3 = vmul.f32 %v3947_v31, %v1380_v34  ;;  %v3954_v17 = vld [vmem:[#allocation31_spill] sm:$0xff]  ;;  %v3956_v60 = vld [vmem:[#allocation29_spill] sm:$0xff] }
 0x2a8   :  { %1929 = vrsqrt.f32 %v1331_v9  ;;  %v1332_v35 = vadd.f32 1e-05, %v1312_v57 }
 0x2a9   :  { %1737 = vst [vmem:[#allocation2 + $0xa0] sm:$0xff] %v1697_v19  ;;  %1738 = vst.msk [vmem:[#allocation2 + $0xa8] sm:$0xff] %vm1036_vm1, %v1698_v49  ;;  %v1699_v61 = vadd.f32 %v3948_v8, %v1539_v24  ;;  %v1700_v26 = vadd.f32 %v3948_v8, %v1540_v3  ;;  %v3957_v3 = vld [vmem:[#allocation18_spill] sm:$0xff] }
 0x2aa   :  { %v1926_v10 = vpop.eup %1925  ;;  %1931 = vrsqrt.f32 %v1332_v35 }
 0x2ab   :  { %1739 = vst [vmem:[#allocation2 + $0xb0] sm:$0xff] %v1699_v61  ;;  %1740 = vst.msk [vmem:[#allocation2 + $0xb8] sm:$0xff] %vm1036_vm1, %v1700_v26  ;;  %v1381_v33 = vmul.f32 %v1926_v10, %v3623_v29  ;;  %v1382_v42 = vmul.f32 %v1926_v10, %v3626_v15  ;;  %v1284_v21 = vpop.xlane.xlu0 %1283 }
 0x2ac   :  { %v1928_v47 = vpop.eup %1927  ;;  %v1313_v58 = vmul.f32 0.0051020407, %v1284_v21 }
 0x2ad   :  { %v1541_v54 = vmul.f32 %v3949_v51, %v1381_v33  ;;  %v1542_v30 = vmul.f32 %v3949_v51, %v1382_v42  ;;  %v1383_v6 = vmul.f32 %v1928_v47, %v3629_v56  ;;  %v1384_v62 = vmul.f32 %v1928_v47, %v3632_v43  ;;  %v1288_v0 = vpop.xlane.xlu1 %1287  ;;  %v3958_v42 = vld [vmem:[#allocation15_spill] sm:$0xff] }
 0x2ae   :  { %v1333_v39 = vadd.f32 1e-05, %v1313_v58  ;;  %v1314_v11 = vmul.f32 0.0051020407, %v1288_v0 }
 0x2af   :  { %v1701_v25 = vadd.f32 %v3950_v22, %v1541_v54  ;;  %v1702_v29 = vadd.f32 %v3950_v22, %v1542_v30  ;;  %v1543_v15 = vmul.f32 %v3951_v37, %v1383_v6  ;;  %v1544_v55 = vmul.f32 %v3951_v37, %v1384_v62  ;;  %v3960_v54 = vld [vmem:[#allocation19_spill] sm:$0xff]  ;;  %v3961_v62 = vld [vmem:[#allocation33_spill] sm:$0xff] }
 0x2b0   :  { %1933 = vrsqrt.f32 %v1333_v39  ;;  %v1334_v50 = vadd.f32 1e-05, %v1314_v11  ;;  %v3962_v39 = vld [vmem:[#allocation34_spill] sm:$0xff] }
 0x2b1   :  { %1741 = vst [vmem:[#allocation2 + $0xc0] sm:$0xff] %v1701_v25  ;;  %1742 = vst.msk [vmem:[#allocation2 + $0xc8] sm:$0xff] %vm1036_vm1, %v1702_v29  ;;  %v1703_v56 = vadd.f32 %v3952_v46, %v1543_v15  ;;  %v1704_v43 = vadd.f32 %v3952_v46, %v1544_v55  ;;  %v3963_v29 = vld [vmem:[#allocation17_spill] sm:$0xff] }
 0x2b2   :  { %v1930_v23 = vpop.eup %1929  ;;  %1935 = vrsqrt.f32 %v1334_v50 }
 0x2b3   :  { %1743 = vst [vmem:[#allocation2 + $0xd0] sm:$0xff] %v1703_v56  ;;  %1744 = vst.msk [vmem:[#allocation2 + $0xd8] sm:$0xff] %vm1036_vm1, %v1704_v43  ;;  %v1385_v36 = vmul.f32 %v1930_v23, %v3645_v52  ;;  %v1386_v5 = vmul.f32 %v1930_v23, %v3648_v28  ;;  %v1292_v2 = vpop.xlane.xlu0 %1291 }
 0x2b4   :  { %v1932_v59 = vpop.eup %1931  ;;  %v1315_v38 = vmul.f32 0.0051020407, %v1292_v2 }
 0x2b5   :  { %v1545_v18 = vmul.f32 %v3953_v32, %v1385_v36  ;;  %v1546_v13 = vmul.f32 %v3953_v32, %v1386_v5  ;;  %v1387_v4 = vmul.f32 %v1932_v59, %v3651_v53  ;;  %v1388_v7 = vmul.f32 %v1932_v59, %v3654_v40  ;;  %v1296_v1 = vpop.xlane.xlu1 %1295 }
 0x2b6   :  { %v1335_v27 = vadd.f32 1e-05, %v1315_v38  ;;  %v1316_v20 = vmul.f32 0.0051020407, %v1296_v1 }
 0x2b7   :  { %v1705_v34 = vadd.f32 %v3954_v17, %v1545_v18  ;;  %v1706_v52 = vadd.f32 %v3954_v17, %v1546_v13  ;;  %v1547_v28 = vmul.f32 %v3955_v16, %v1387_v4  ;;  %v1548_v9 = vmul.f32 %v3955_v16, %v1388_v7 }
 0x2b8   :  { %1937 = vrsqrt.f32 %v1335_v27  ;;  %v1336_v57 = vadd.f32 1e-05, %v1316_v20 }
 0x2b9   :  { %1745 = vst [vmem:[#allocation2 + $0xe0] sm:$0xff] %v1705_v34  ;;  %1746 = vst.msk [vmem:[#allocation2 + $0xe8] sm:$0xff] %vm1036_vm1, %v1706_v52  ;;  %v1707_v53 = vadd.f32 %v3956_v60, %v1547_v28  ;;  %v1708_v40 = vadd.f32 %v3956_v60, %v1548_v9 }
 0x2ba   :  { %v1934_v19 = vpop.eup %1933  ;;  %1939 = vrsqrt.f32 %v1336_v57 }
 0x2bb   :  { %1747 = vst [vmem:[#allocation2 + $0xf0] sm:$0xff] %v1707_v53  ;;  %1748 = vst.msk [vmem:[#allocation2 + $0xf8] sm:$0xff] %vm1036_vm1, %v1708_v40  ;;  %v1389_v49 = vmul.f32 %v1934_v19, %v3667_v63  ;;  %v1390_v31 = vmul.f32 %v1934_v19, %v3670_v48  ;;  %v1675_v15 = vpop.permute.xlu0 %1674 }
 0x2bc   :  { %v1936_v24 = vpop.eup %1935 }
 0x2bd   :  { %v1549_v35 = vmul.f32 %v3957_v3, %v1389_v49  ;;  %v1550_v8 = vmul.f32 %v3957_v3, %v1390_v31  ;;  %v1391_v61 = vmul.f32 %v1936_v24, %v3673_v14  ;;  %v1392_v26 = vmul.f32 %v1936_v24, %v3676_v12  ;;  %v3959_v12 = vld [vmem:[#allocation32_spill] sm:$0xff] }
 0x2bf   :  { %v1709_v10 = vadd.f32 %v3718_v41, %v1549_v35  ;;  %v1710_v33 = vadd.f32 %v3718_v41, %v1550_v8  ;;  %v1551_v21 = vmul.f32 %v3958_v42, %v1391_v61  ;;  %v1552_v47 = vmul.f32 %v3958_v42, %v1392_v26 }
 0x2c1   :  { %1749 = vst [vmem:[#allocation2 + $0x100] sm:$0xff] %v1709_v10  ;;  %1750 = vst.msk [vmem:[#allocation2 + $0x108] sm:$0xff] %vm1036_vm1, %v1710_v33  ;;  %v1711_v63 = vadd.f32 %v3716_v44, %v1551_v21  ;;  %v1712_v48 = vadd.f32 %v3716_v44, %v1552_v47  ;;  %v1670_v44 = vpop.permute.xlu1 %1669 }
 0x2c2   :  { %v1938_v58 = vpop.eup %1937 }
 0x2c3   :  { %1751 = vst [vmem:[#allocation2 + $0x110] sm:$0xff] %v1711_v63  ;;  %1752 = vst.msk [vmem:[#allocation2 + $0x118] sm:$0xff] %vm1036_vm1, %v1712_v48  ;;  %v1393_v14 = vmul.f32 %v1938_v58, %v3689_v45  ;;  %v1394_v51 = vmul.f32 %v1938_v58, %v3959_v12 }
 0x2c4   :  { %v1940_v41 = vpop.eup %1939 }
 0x2c5   :  { %v1553_v30 = vmul.f32 %v3960_v54, %v1393_v14  ;;  %v1554_v6 = vmul.f32 %v3960_v54, %v1394_v51  ;;  %v1395_v0 = vmul.f32 %v1940_v41, %v3961_v62  ;;  %v1396_v11 = vmul.f32 %v1940_v41, %v3962_v39 }
 0x2c7   :  { %v1713_v22 = vadd.f32 %v1670_v44, %v1553_v30  ;;  %v1714_v25 = vadd.f32 %v1670_v44, %v1554_v6  ;;  %v1555_v37 = vmul.f32 %v3963_v29, %v1395_v0  ;;  %v1556_v45 = vmul.f32 %v3963_v29, %v1396_v11 }
 0x2c9   :  { %1753 = vst [vmem:[#allocation2 + $0x120] sm:$0xff] %v1713_v22  ;;  %1754 = vst.msk [vmem:[#allocation2 + $0x128] sm:$0xff] %vm1036_vm1, %v1714_v25  ;;  %v1715_v55 = vadd.f32 %v1675_v15, %v1555_v37  ;;  %v1716_v50 = vadd.f32 %v1675_v15, %v1556_v45 }
 0x2cb   :  { %1755 = vst [vmem:[#allocation2 + $0x130] sm:$0xff] %v1715_v55  ;;  %1756 = vst.msk [vmem:[#allocation2 + $0x138] sm:$0xff] %vm1036_vm1, %v1716_v50 }
 0x2cc   :  { %1952 = shalt.err (!%p1949_p4)
}
 0x2cd   :  { %s1953_s26 = scalar_lea.hbm %s3873_s5, 5120 }
 0x2ce   :  { %p1954_p5 = scmp.ne.s32.totalorder %s3873_s5, %s1953_s26  ;;  %p1957_p6 = scmp.lt.u32.totalorder %s1953_s26, %s3873_s5 }
 0x2d0   :  { %p1959_p7 = pnand %p1957_p6, %p1954_p5 }
 0x2d2   :  { %1962 = shalt.err (!%p1959_p7)
}
 0x2d3   :  { %s1967_s29 = smov 256   ;;  %s1968_s30 = smov 16  }
 0x2d4   :  { %1768 = dma.vmem_to_hbm [thread:$0]  %s1763_s22, 5120, %s3873_s5, [#allocation3], %s1967_s29, %s1967_s29, %s1968_s30  }
 0x2d5   :  { %1963 = dma.done.wait [#allocation3], 5120  }
 0x2d6   :  { %1964 = vsyncadd [#allocation3], 4294962176 }
 0x2d7   :  { %1772 = vsyncpa [#allocation3], 1 }

</bundles_post_ra>
